<compile_context>
chip_gen: v5e
topology: v5e:2x2
jax: 0.10.0
libtpu: 0.0.40
codegen_flags: <defaults>
</compile_context>

<pallas_src>
import functools

import jax
import jax.numpy as jnp
import numpy as np
from jax import lax
from jax.experimental import pallas as pl
from jax.experimental.pallas import tpu as pltpu

EPS = 1e-5
_LANE = 128
_SUBLANE = 8


def _round_up(x, m):
    return ((x + m - 1) // m) * m


def _vmem_limit_bytes():
    """~Half of the physical per-core VMEM (128 MiB on v5e/v6e, 64 MiB on v7x)."""
    try:
        cap = int(pltpu.get_tpu_info().vmem_capacity_bytes)
        return max(32 * 1024 * 1024, min(cap // 2, 100 * 1024 * 1024))
    except Exception:
        return 32 * 1024 * 1024  # conservative fallback (v7x scoped default)


def _bn_scale_shift(h, hm, gamma, beta, inv_count):
    """Training-mode BatchNorm2d batch stats folded into per-channel scale/shift.

    h  : [Cp, W] f32 pre-normalization activation.
    hm : h * interior_mask, computed ONCE by the caller and reused for both sums.
    Lane reductions go to the XLU slot; only the hm*h multiply touches the VPU.
    """
    s = jnp.sum(hm, axis=1, keepdims=True)                 # [Cp, 1]
    ss = jnp.sum(hm * h, axis=1, keepdims=True)            # [Cp, 1]
    mean = s * inv_count
    # Single-pass E[x^2] - mean^2, clamped so it can't go negative / NaN.
    # TODO(synk): switch to a two-pass/Welford variance if reused where |mean| >> std.
    var = jnp.maximum(ss * inv_count - mean * mean, 0.0)
    inv = lax.rsqrt(var + EPS)
    scale = gamma * inv
    shift = beta - mean * scale
    return scale, shift


def _resblock_kernel(x_ref, mask1_ref, mask2_ref,
                     w1_ref, b1_ref, g1_ref, be1_ref,
                     w2_ref, b2_ref, g2_ref, be2_ref,
                     o_ref, *, wp, flat_pad, m1, m_out, inv_count, blk,
                     mxu_dtype, precision):
    """Refs (all whole-array VMEM blocks, lane widths multiples of 128):
         x_ref     : [blk, XW]      padded input grid, flattened, 2*flat_pad halo each side
         mask1_ref : [1, m1]        image-interior indicator on the conv1 domain
         mask2_ref : [1, m_out]     image-interior indicator on the output domain
         wN_ref    : [cp, 9*blk]    im2col-stacked weights (tap-major blocks of `blk` rows)
         b/g/be    : [cp, 1]
         o_ref     : [cp, m_out]    lane-dense, 128-aligned output slab
    """
    cp = o_ref.shape[0]          # f32 channel rows (8)
    p = flat_pad

    def conv3x3(src, w_ref, b_ref, width):
        # im2col: stack the 9 shifted windows along sublanes (each block is `blk` rows,
        # i.e. tile-aligned for mxu_dtype) and contract taps x channels in ONE MXU dot.
        taps = []
        for k in range(9):
            dy, dx = divmod(k, 3)
            off = (dy - 1) * wp + (dx - 1)                 # flattened-grid tap offset
            taps.append(src[:, p + off: p + off + width])
        patch = jnp.concatenate(taps, axis=0)              # [9*blk, width], mxu_dtype
        return jnp.dot(w_ref[...], patch,
                       preferred_element_type=jnp.float32,
                       precision=precision) + b_ref[...]   # bias broadcast along lanes

    # Hoisted cast: the whole input slab goes to the MXU operand dtype in one pass.
    xb = x_ref[...].astype(mxu_dtype)                      # [blk, XW]

    # ---- conv1 + ReLU ----
    h = jnp.maximum(conv3x3(xb, w1_ref, b1_ref, m1), 0.0)  # [cp, m1] f32

    # ---- BatchNorm #1 (batch stats over the image interior) ----
    mask1 = mask1_ref[...]
    hm = h * mask1                                         # reused for both BN sums
    scale1, shift1 = _bn_scale_shift(h, hm, g1_ref[...], be1_ref[...], inv_count)
    # Normalize + interior mask (this zeroing IS conv2's zero padding), fused with the
    # mxu_dtype cast.  Channel rows are padded to `blk` in f32 *before* the cast so the
    # subsequent patch concatenation stays tile-aligned for packed dtypes.
    hn = (h * scale1 + shift1) * mask1                     # [cp, m1] f32
    if blk > cp:
        hn = jnp.concatenate([hn, jnp.zeros((blk - cp, m1), jnp.float32)], axis=0)
    hb = hn.astype(mxu_dtype)                              # [blk, m1]

    # ---- conv2 + BatchNorm #2 ----
    h2 = conv3x3(hb, w2_ref, b2_ref, m_out)                # [cp, m_out] f32
    mask2 = mask2_ref[...]
    scale2, shift2 = _bn_scale_shift(h2, h2 * mask2, g2_ref[...], be2_ref[...], inv_count)

    # ---- residual (from the same slab, no separate input) + ReLU ----
    # Ring / tail lanes are discarded by the wrapper, so no output mask multiply is needed;
    # the store is a full-width unmasked lane-dense vst.
    res = x_ref[:cp, 2 * p: 2 * p + m_out]
    o_ref[...] = jnp.maximum(h2 * scale2 + shift2 + res, 0.0).astype(o_ref.dtype)


def resblock_forward(x_nchw, params, *, mxu_dtype=jnp.bfloat16):
    """Fused ResBlock forward.  x_nchw: [N, C, H, W] (PyTorch layout).

    mxu_dtype: operand dtype for the conv matmuls (accumulation is always f32).
    bf16 is the recommended setting on v6e/v7x; float32 gives strict PyTorch numerics
    (in-kernel dots then run with precision=HIGHEST).
    """
    N, C, H, W = x_nchw.shape
    cp = _round_up(C, _SUBLANE)                            # f32 channel rows
    # Per-tap in-channel rows in the im2col patch = native sublane tile of mxu_dtype
    # (8 for f32, 16 for bf16) so in-kernel sublane concatenations are tile-aligned.
    tile = _SUBLANE * (4 // jnp.dtype(mxu_dtype).itemsize)
    blk = _round_up(cp, tile)

    Hp, Wp = H + 4, W + 4                                  # 2-pixel halo covers both convs
    M = N * Hp * Wp                                        # flattened padded grid size
    P = Wp + 1                                             # flat halo covering any 3x3 tap
    Mo = _round_up(M, _LANE)                               # output width (128-aligned)
    M1 = _round_up(Mo + 2 * P, _LANE)                      # conv1 domain width (128-aligned)
    XW = _round_up(M1 + 2 * P, _LANE)                      # input slab width (128-aligned)
    inv_count = 1.0 / float(N * H * W)

    # ---- host-side layout plumbing (cheap XLA pads / reshapes / transposes, no compute) --
    xg = jnp.pad(x_nchw, ((0, 0), (0, 0), (2, 2), (2, 2)))
    xg = jnp.transpose(xg, (1, 0, 2, 3)).reshape(C, M)                     # [C, M]
    x_slab = jnp.pad(xg, ((0, blk - C), (2 * P, XW - 2 * P - M)))          # [blk, XW]

    interior = jnp.pad(jnp.ones((N, H, W), jnp.float32),
                       ((0, 0), (2, 2), (2, 2))).reshape(1, M)
    mask1 = jnp.pad(interior, ((0, 0), (P, M1 - P - M)))                   # [1, M1]
    mask2 = jnp.pad(interior, ((0, 0), (0, Mo - M)))                       # [1, Mo]

    def prep_w(w9):  # [9, Cin, Cout] (HWIO flattened) -> [cp, 9*blk] stacked im2col weight
        wt = jnp.transpose(w9, (0, 2, 1))                                  # [9, Cout, Cin]
        wt = jnp.pad(wt, ((0, 0), (0, cp - C), (0, blk - C)))              # [9, cp, blk]
        return jnp.transpose(wt, (1, 0, 2)).reshape(cp, 9 * blk).astype(mxu_dtype)

    def prep_v(v):   # [C] -> [cp, 1] (f32)
        return jnp.pad(v, (0, cp - C)).reshape(cp, 1)

    precision = (lax.Precision.HIGHEST
                 if jnp.dtype(mxu_dtype) == jnp.dtype(jnp.float32) else None)
    kernel = functools.partial(
        _resblock_kernel, wp=Wp, flat_pad=P, m1=M1, m_out=Mo,
        inv_count=inv_count, blk=blk, mxu_dtype=mxu_dtype, precision=precision)

    vmem = pl.BlockSpec(memory_space=pltpu.MemorySpace.VMEM)
    out2d = pl.pallas_call(
        kernel,
        out_shape=jax.ShapeDtypeStruct((cp, Mo), x_nchw.dtype),
        in_specs=[vmem] * 11,
        out_specs=vmem,
        compiler_params=pltpu.CompilerParams(vmem_limit_bytes=_vmem_limit_bytes()),
    )(x_slab, mask1, mask2,
      prep_w(params['w1']), prep_v(params['b1']), prep_v(params['g1']), prep_v(params['be1']),
      prep_w(params['w2']), prep_v(params['b2']), prep_v(params['g2']), prep_v(params['be2']))

    # Lane-dense [cp, Mo] output slab back to the NCHW interior.
    y = out2d[:C, :M].reshape(C, N, Hp, Wp)[:, :, 2:2 + H, 2:2 + W]
    return jnp.transpose(y, (1, 0, 2, 3))


def resblock_ref(x_nchw, params, *, mxu_dtype=jnp.bfloat16):
    """Pure-JAX reference with the same conv-operand dtype (f32 accumulation, f32 BN)."""
    x = jnp.transpose(x_nchw, (0, 2, 3, 1))
    C = x.shape[-1]

    def conv(h, w9, b):
        w = w9.reshape(3, 3, C, C)
        return lax.conv_general_dilated(
            h.astype(mxu_dtype), w.astype(mxu_dtype), (1, 1), 'SAME',
            dimension_numbers=('NHWC', 'HWIO', 'NHWC'),
            precision=lax.Precision.HIGHEST,
            preferred_element_type=jnp.float32) + b

    def bn(h, g, be):
        m = h.mean(axis=(0, 1, 2))
        v = ((h - m) ** 2).mean(axis=(0, 1, 2))
        return (h - m) * lax.rsqrt(v + EPS) * g + be

    h = jnp.maximum(conv(x, params['w1'], params['b1']), 0.0)
    h = bn(h, params['g1'], params['be1'])
    h = conv(h, params['w2'], params['b2'])
    h = bn(h, params['g2'], params['be2'])
    y = jnp.maximum(h + x, 0.0)
    return jnp.transpose(y, (0, 3, 1, 2))


if __name__ == "__main__":
    N, C, H, W = 2, 4, 16, 16
    key = jax.random.PRNGKey(0)
    ks = jax.random.split(key, 9)

    x = jax.random.normal(ks[0], (N, C, H, W), jnp.float32)
    # Conv weights stored as [9, Cin, Cout] (k = dy*3 + dx), i.e. HWIO flattened.
    params = dict(
        w1=0.1 * jax.random.normal(ks[1], (9, C, C), jnp.float32),
        b1=0.1 * jax.random.normal(ks[2], (C,), jnp.float32),
        g1=1.0 + 0.1 * jax.random.normal(ks[3], (C,), jnp.float32),
        be1=0.1 * jax.random.normal(ks[4], (C,), jnp.float32),
        w2=0.1 * jax.random.normal(ks[5], (9, C, C), jnp.float32),
        b2=0.1 * jax.random.normal(ks[6], (C,), jnp.float32),
        g2=1.0 + 0.1 * jax.random.normal(ks[7], (C,), jnp.float32),
        be2=0.1 * jax.random.normal(ks[8], (C,), jnp.float32),
    )

    # Production path: bf16 MXU operands (per v6e/v7x guidance), f32 accumulation + f32 BN.
    y = resblock_forward(x, params, mxu_dtype=jnp.bfloat16)
    jax.block_until_ready(y)
    y_ref = resblock_ref(x, params, mxu_dtype=jnp.bfloat16)
    # Tolerance covers bf16 operand rounding only (all accumulation / BN math stays f32).
    np.testing.assert_allclose(np.asarray(y), np.asarray(y_ref), rtol=2e-2, atol=2e-2)

    # Strict-numerics path: f32 MXU operands with precision=HIGHEST on both the kernel's
    # dots and the reference conv; only summation-order noise remains.
    y32 = resblock_forward(x, params, mxu_dtype=jnp.float32)
    jax.block_until_ready(y32)
    y32_ref = resblock_ref(x, params, mxu_dtype=jnp.float32)
    np.testing.assert_allclose(np.asarray(y32), np.asarray(y32_ref), rtol=2e-3, atol=2e-3)

    print("KERNEL_OK")
</pallas_src>

<mosaic_0001>
module attributes {stable_mosaic.version = 11 : i64} {
  func.func @_resblock_kernel(%arg0: memref<16x1152xf32, #tpu.memory_space<vmem>>, %arg1: memref<1x1024xf32, #tpu.memory_space<vmem>>, %arg2: memref<1x896xf32, #tpu.memory_space<vmem>>, %arg3: memref<8x144xbf16, #tpu.memory_space<vmem>>, %arg4: memref<8x1xf32, #tpu.memory_space<vmem>>, %arg5: memref<8x1xf32, #tpu.memory_space<vmem>>, %arg6: memref<8x1xf32, #tpu.memory_space<vmem>>, %arg7: memref<8x144xbf16, #tpu.memory_space<vmem>>, %arg8: memref<8x1xf32, #tpu.memory_space<vmem>>, %arg9: memref<8x1xf32, #tpu.memory_space<vmem>>, %arg10: memref<8x1xf32, #tpu.memory_space<vmem>>, %arg11: memref<8x896xf32, #tpu.memory_space<vmem>>) attributes {dimension_semantics = [], scalar_prefetch = 0 : i64, scratch_operands = 0 : i64, tpu.core_type = #tpu.core_type<tc>} {
    %c0 = arith.constant 0 : index
    %c0_0 = arith.constant 0 : index
    %0 = vector.load %arg0[%c0, %c0_0] : memref<16x1152xf32, #tpu.memory_space<vmem>>, vector<16x1152xf32>
    %1 = arith.truncf %0 : vector<16x1152xf32> to vector<16x1152xbf16>
    %2 = vector.extract_strided_slice %1 {offsets = [0, 0], sizes = [16, 1024], strides = [1, 1]} : vector<16x1152xbf16> to vector<16x1024xbf16>
    %3 = vector.extract_strided_slice %1 {offsets = [0, 1], sizes = [16, 1024], strides = [1, 1]} : vector<16x1152xbf16> to vector<16x1024xbf16>
    %4 = vector.extract_strided_slice %1 {offsets = [0, 2], sizes = [16, 1024], strides = [1, 1]} : vector<16x1152xbf16> to vector<16x1024xbf16>
    %5 = vector.extract_strided_slice %1 {offsets = [0, 20], sizes = [16, 1024], strides = [1, 1]} : vector<16x1152xbf16> to vector<16x1024xbf16>
    %6 = vector.extract_strided_slice %1 {offsets = [0, 21], sizes = [16, 1024], strides = [1, 1]} : vector<16x1152xbf16> to vector<16x1024xbf16>
    %7 = vector.extract_strided_slice %1 {offsets = [0, 22], sizes = [16, 1024], strides = [1, 1]} : vector<16x1152xbf16> to vector<16x1024xbf16>
    %8 = vector.extract_strided_slice %1 {offsets = [0, 40], sizes = [16, 1024], strides = [1, 1]} : vector<16x1152xbf16> to vector<16x1024xbf16>
    %9 = vector.extract_strided_slice %1 {offsets = [0, 41], sizes = [16, 1024], strides = [1, 1]} : vector<16x1152xbf16> to vector<16x1024xbf16>
    %10 = vector.extract_strided_slice %1 {offsets = [0, 42], sizes = [16, 1024], strides = [1, 1]} : vector<16x1152xbf16> to vector<16x1024xbf16>
    %11 = tpu.concatenate %2, %3, %4, %5, %6, %7, %8, %9, %10 in 0 : vector<16x1024xbf16>, vector<16x1024xbf16>, vector<16x1024xbf16>, vector<16x1024xbf16>, vector<16x1024xbf16>, vector<16x1024xbf16>, vector<16x1024xbf16>, vector<16x1024xbf16>, vector<16x1024xbf16> -> vector<144x1024xbf16>
    %c0_1 = arith.constant 0 : index
    %c0_2 = arith.constant 0 : index
    %12 = vector.load %arg3[%c0_1, %c0_2] : memref<8x144xbf16, #tpu.memory_space<vmem>>, vector<8x144xbf16>
    %cst = arith.constant dense<0.000000e+00> : vector<8x1024xf32>
    %13 = tpu.matmul %12, %11, %cst {dimension_numbers = #tpu.dot_dimension_numbers<[1], [0], [0], [1], [0, 0, 1, 1], [], []>} : vector<8x144xbf16>, vector<144x1024xbf16>, vector<8x1024xf32> -> vector<8x1024xf32>
    %c0_3 = arith.constant 0 : index
    %c0_4 = arith.constant 0 : index
    %14 = vector.load %arg4[%c0_3, %c0_4] : memref<8x1xf32, #tpu.memory_space<vmem>>, vector<8x1xf32>
    %15 = vector.broadcast %14 : vector<8x1xf32> to vector<8x1024xf32>
    %16 = arith.addf %13, %15 : vector<8x1024xf32>
    %cst_5 = arith.constant 0.000000e+00 : f32
    %17 = vector.broadcast %cst_5 : f32 to vector<8x1024xf32>
    %18 = arith.maximumf %16, %17 : vector<8x1024xf32>
    %c0_6 = arith.constant 0 : index
    %c0_7 = arith.constant 0 : index
    %19 = vector.load %arg1[%c0_6, %c0_7] : memref<1x1024xf32, #tpu.memory_space<vmem>>, vector<1x1024xf32>
    %20 = vector.broadcast %19 : vector<1x1024xf32> to vector<8x1024xf32>
    %21 = arith.mulf %18, %20 : vector<8x1024xf32>
    %c0_8 = arith.constant 0 : index
    %c0_9 = arith.constant 0 : index
    %22 = vector.load %arg5[%c0_8, %c0_9] : memref<8x1xf32, #tpu.memory_space<vmem>>, vector<8x1xf32>
    %c0_10 = arith.constant 0 : index
    %c0_11 = arith.constant 0 : index
    %23 = vector.load %arg6[%c0_10, %c0_11] : memref<8x1xf32, #tpu.memory_space<vmem>>, vector<8x1xf32>
    %cst_12 = arith.constant dense<0.000000e+00> : vector<8xf32>
    %24 = vector.multi_reduction <add>, %21, %cst_12 [1] : vector<8x1024xf32> to vector<8xf32>
    %25 = vector.shape_cast %24 : vector<8xf32> to vector<8x1xf32>
    %26 = arith.mulf %21, %18 : vector<8x1024xf32>
    %cst_13 = arith.constant dense<0.000000e+00> : vector<8xf32>
    %27 = vector.multi_reduction <add>, %26, %cst_13 [1] : vector<8x1024xf32> to vector<8xf32>
    %28 = vector.shape_cast %27 : vector<8xf32> to vector<8x1xf32>
    %cst_14 = arith.constant 0.001953125 : f32
    %29 = vector.broadcast %cst_14 : f32 to vector<8x1xf32>
    %30 = arith.mulf %25, %29 : vector<8x1xf32>
    %cst_15 = arith.constant 0.001953125 : f32
    %31 = vector.broadcast %cst_15 : f32 to vector<8x1xf32>
    %32 = arith.mulf %28, %31 : vector<8x1xf32>
    %33 = arith.mulf %30, %30 : vector<8x1xf32>
    %34 = arith.subf %32, %33 : vector<8x1xf32>
    %cst_16 = arith.constant 0.000000e+00 : f32
    %35 = vector.broadcast %cst_16 : f32 to vector<8x1xf32>
    %36 = arith.maximumf %34, %35 : vector<8x1xf32>
    %cst_17 = arith.constant 9.99999974E-6 : f32
    %37 = vector.broadcast %cst_17 : f32 to vector<8x1xf32>
    %38 = arith.addf %36, %37 : vector<8x1xf32>
    %39 = math.rsqrt %38 : vector<8x1xf32>
    %40 = arith.mulf %22, %39 : vector<8x1xf32>
    %41 = arith.mulf %30, %40 : vector<8x1xf32>
    %42 = arith.subf %23, %41 : vector<8x1xf32>
    %43 = vector.broadcast %40 : vector<8x1xf32> to vector<8x1024xf32>
    %44 = arith.mulf %18, %43 : vector<8x1024xf32>
    %45 = vector.broadcast %42 : vector<8x1xf32> to vector<8x1024xf32>
    %46 = arith.addf %44, %45 : vector<8x1024xf32>
    %47 = vector.broadcast %19 : vector<1x1024xf32> to vector<8x1024xf32>
    %48 = arith.mulf %46, %47 : vector<8x1024xf32>
    %cst_18 = arith.constant 0.000000e+00 : f32
    %49 = vector.broadcast %cst_18 : f32 to vector<8x1024xf32>
    %50 = tpu.concatenate %48, %49 in 0 : vector<8x1024xf32>, vector<8x1024xf32> -> vector<16x1024xf32>
    %51 = arith.truncf %50 : vector<16x1024xf32> to vector<16x1024xbf16>
    %52 = vector.extract_strided_slice %51 {offsets = [0, 0], sizes = [16, 896], strides = [1, 1]} : vector<16x1024xbf16> to vector<16x896xbf16>
    %53 = vector.extract_strided_slice %51 {offsets = [0, 1], sizes = [16, 896], strides = [1, 1]} : vector<16x1024xbf16> to vector<16x896xbf16>
    %54 = vector.extract_strided_slice %51 {offsets = [0, 2], sizes = [16, 896], strides = [1, 1]} : vector<16x1024xbf16> to vector<16x896xbf16>
    %55 = vector.extract_strided_slice %51 {offsets = [0, 20], sizes = [16, 896], strides = [1, 1]} : vector<16x1024xbf16> to vector<16x896xbf16>
    %56 = vector.extract_strided_slice %51 {offsets = [0, 21], sizes = [16, 896], strides = [1, 1]} : vector<16x1024xbf16> to vector<16x896xbf16>
    %57 = vector.extract_strided_slice %51 {offsets = [0, 22], sizes = [16, 896], strides = [1, 1]} : vector<16x1024xbf16> to vector<16x896xbf16>
    %58 = vector.extract_strided_slice %51 {offsets = [0, 40], sizes = [16, 896], strides = [1, 1]} : vector<16x1024xbf16> to vector<16x896xbf16>
    %59 = vector.extract_strided_slice %51 {offsets = [0, 41], sizes = [16, 896], strides = [1, 1]} : vector<16x1024xbf16> to vector<16x896xbf16>
    %60 = vector.extract_strided_slice %51 {offsets = [0, 42], sizes = [16, 896], strides = [1, 1]} : vector<16x1024xbf16> to vector<16x896xbf16>
    %61 = tpu.concatenate %52, %53, %54, %55, %56, %57, %58, %59, %60 in 0 : vector<16x896xbf16>, vector<16x896xbf16>, vector<16x896xbf16>, vector<16x896xbf16>, vector<16x896xbf16>, vector<16x896xbf16>, vector<16x896xbf16>, vector<16x896xbf16>, vector<16x896xbf16> -> vector<144x896xbf16>
    %c0_19 = arith.constant 0 : index
    %c0_20 = arith.constant 0 : index
    %62 = vector.load %arg7[%c0_19, %c0_20] : memref<8x144xbf16, #tpu.memory_space<vmem>>, vector<8x144xbf16>
    %cst_21 = arith.constant dense<0.000000e+00> : vector<8x896xf32>
    %63 = tpu.matmul %62, %61, %cst_21 {dimension_numbers = #tpu.dot_dimension_numbers<[1], [0], [0], [1], [0, 0, 1, 1], [], []>} : vector<8x144xbf16>, vector<144x896xbf16>, vector<8x896xf32> -> vector<8x896xf32>
    %c0_22 = arith.constant 0 : index
    %c0_23 = arith.constant 0 : index
    %64 = vector.load %arg8[%c0_22, %c0_23] : memref<8x1xf32, #tpu.memory_space<vmem>>, vector<8x1xf32>
    %65 = vector.broadcast %64 : vector<8x1xf32> to vector<8x896xf32>
    %66 = arith.addf %63, %65 : vector<8x896xf32>
    %c0_24 = arith.constant 0 : index
    %c0_25 = arith.constant 0 : index
    %67 = vector.load %arg2[%c0_24, %c0_25] : memref<1x896xf32, #tpu.memory_space<vmem>>, vector<1x896xf32>
    %68 = vector.broadcast %67 : vector<1x896xf32> to vector<8x896xf32>
    %69 = arith.mulf %66, %68 : vector<8x896xf32>
    %c0_26 = arith.constant 0 : index
    %c0_27 = arith.constant 0 : index
    %70 = vector.load %arg9[%c0_26, %c0_27] : memref<8x1xf32, #tpu.memory_space<vmem>>, vector<8x1xf32>
    %c0_28 = arith.constant 0 : index
    %c0_29 = arith.constant 0 : index
    %71 = vector.load %arg10[%c0_28, %c0_29] : memref<8x1xf32, #tpu.memory_space<vmem>>, vector<8x1xf32>
    %cst_30 = arith.constant dense<0.000000e+00> : vector<8xf32>
    %72 = vector.multi_reduction <add>, %69, %cst_30 [1] : vector<8x896xf32> to vector<8xf32>
    %73 = vector.shape_cast %72 : vector<8xf32> to vector<8x1xf32>
    %74 = arith.mulf %69, %66 : vector<8x896xf32>
    %cst_31 = arith.constant dense<0.000000e+00> : vector<8xf32>
    %75 = vector.multi_reduction <add>, %74, %cst_31 [1] : vector<8x896xf32> to vector<8xf32>
    %76 = vector.shape_cast %75 : vector<8xf32> to vector<8x1xf32>
    %cst_32 = arith.constant 0.001953125 : f32
    %77 = vector.broadcast %cst_32 : f32 to vector<8x1xf32>
    %78 = arith.mulf %73, %77 : vector<8x1xf32>
    %cst_33 = arith.constant 0.001953125 : f32
    %79 = vector.broadcast %cst_33 : f32 to vector<8x1xf32>
    %80 = arith.mulf %76, %79 : vector<8x1xf32>
    %81 = arith.mulf %78, %78 : vector<8x1xf32>
    %82 = arith.subf %80, %81 : vector<8x1xf32>
    %cst_34 = arith.constant 0.000000e+00 : f32
    %83 = vector.broadcast %cst_34 : f32 to vector<8x1xf32>
    %84 = arith.maximumf %82, %83 : vector<8x1xf32>
    %cst_35 = arith.constant 9.99999974E-6 : f32
    %85 = vector.broadcast %cst_35 : f32 to vector<8x1xf32>
    %86 = arith.addf %84, %85 : vector<8x1xf32>
    %87 = math.rsqrt %86 : vector<8x1xf32>
    %88 = arith.mulf %70, %87 : vector<8x1xf32>
    %89 = arith.mulf %78, %88 : vector<8x1xf32>
    %90 = arith.subf %71, %89 : vector<8x1xf32>
    %c0_36 = arith.constant 0 : index
    %c42 = arith.constant 42 : index
    %91 = vector.load %arg0[%c0_36, %c42] : memref<16x1152xf32, #tpu.memory_space<vmem>>, vector<8x896xf32>
    %92 = vector.broadcast %88 : vector<8x1xf32> to vector<8x896xf32>
    %93 = arith.mulf %66, %92 : vector<8x896xf32>
    %94 = vector.broadcast %90 : vector<8x1xf32> to vector<8x896xf32>
    %95 = arith.addf %93, %94 : vector<8x896xf32>
    %96 = arith.addf %95, %91 : vector<8x896xf32>
    %cst_37 = arith.constant 0.000000e+00 : f32
    %97 = vector.broadcast %cst_37 : f32 to vector<8x896xf32>
    %98 = arith.maximumf %96, %97 : vector<8x896xf32>
    %c0_38 = arith.constant 0 : index
    %c0_39 = arith.constant 0 : index
    %99 = vector.load %arg11[%c0_38, %c0_39] : memref<8x896xf32, #tpu.memory_space<vmem>>, vector<8x896xf32>
    tpu.vector_store %arg11[%c0_38, %c0_39], %98 {strides = array<i32>} : memref<8x896xf32, #tpu.memory_space<vmem>>, vector<8x896xf32>,
    return
  }
}

</mosaic_0001>

<bundles_post_ra>
// kernel: tpu_custom_call.1
= control target key start
LH: loop header
LB: loop body
LE: loop exit
PB: predicated region body
PF: predicated region fallthrough
CT: control target
= control target key end

     0   :  { %16 = vsyncpa [#allocation3], 0  ;;  %s2372_s0 = inlined_call_operand.hbm [shape: f32[16,1152], index: 0, kind: input, shape index: {}]   ;;  %s2373_s1 = inlined_call_operand.vmem [shape: f32[1,1024], index: 1, kind: input, shape index: {}]   ;;  %s2374_s2 = inlined_call_operand.vmem [shape: f32[1,896], index: 2, kind: input, shape index: {}]   ;;  %s2375_s3 = inlined_call_operand.vmem [shape: bf16[8,144], index: 3, kind: input, shape index: {}]   ;;  %s2376_s4 = inlined_call_operand.vmem [shape: f32[8,1], index: 4, kind: input, shape index: {}]   ;;  %s2377_s5 = inlined_call_operand.vmem [shape: f32[8,1], index: 5, kind: input, shape index: {}]   ;;  %s2378_s6 = inlined_call_operand.vmem [shape: f32[8,1], index: 6, kind: input, shape index: {}]   ;;  %s2379_s7 = inlined_call_operand.vmem [shape: bf16[8,144], index: 7, kind: input, shape index: {}]   ;;  %s2380_s8 = inlined_call_operand.vmem [shape: f32[8,1], index: 8, kind: input, shape index: {}]   ;;  %s2381_s9 = inlined_call_operand.vmem [shape: f32[8,1], index: 9, kind: input, shape index: {}]   ;;  %s2382_s10 = inlined_call_operand.vmem [shape: f32[8,1], index: 10, kind: input, shape index: {}]   ;;  %s2383_s11 = inlined_call_operand.hbm [shape: f32[8,896], index: 11, kind: output, shape index: {}]  }
   0x1   :  { %17 = vsyncpa [#allocation4], 0  ;;  %s22_s19 = sshll.u32 %s2372_s0, 4  ;;  %s1485_s20 = smov [#allocation2]   ;;  %s23_s19 = int_to_ptr.hbm [resolvable:$true] %s22_s19 }
   0x2   :  { %s24_s21 = sshll.u32 %s1485_s20, 4  ;;  %s1486_s22 = smov 1152   ;;  %s25_s21 = int_to_ptr.vmem [resolvable:$true] %s24_s21 }
   0x3   :  { %s1487_s23 = smov 72  }
   0x4   :  { %30 = dma.hbm_to_vmem [thread:$0]  %s23_s19, 2304, %s25_s21, [#allocation3], %s1486_s22, %s1486_s22, %s1487_s23  }
   0x5   :  { %1481 = dma.done.wait [#allocation3], 2304  }
   0x6   :  { %1482 = vsyncadd [#allocation3], 4294964992  ;;  %v58_v0 = vld [vmem:[#allocation2 + $0x10] sm:$0xff]  ;;  %v59_v1 = vld [vmem:[#allocation2 + $0x18] sm:$0xff]  ;;  %s1488_s0 = smov 88   ;;  %s1489_s24 = smov 87  }
   0x7   :  { %v67_v2 = vld [vmem:[#allocation2 + $0x58] sm:$0xff]  ;;  %v68_v3 = vld [vmem:[#allocation2 + $0x60] sm:$0xff]  ;;  %v75_v4 = vpack.c.bf16 %v59_v1, %v58_v0  ;;  %v57_v6 = vld [vmem:[#allocation2 + $0x8] sm:$0xff]  ;;  %s1490_s25 = smov 106   ;;  %s1491_s26 = smov 86   ;;  %vm357_vm0 = vcmask 711680  }
   0x8   :  { %v56_v5 = vld [vmem:[#allocation2] sm:$0xff]  ;;  %v80_v7 = vpack.c.bf16 %v68_v3, %v67_v2  ;;  %v65_v8 = vld [vmem:[#allocation2 + $0x48] sm:$0xff]  ;;  %v66_v9 = vld [vmem:[#allocation2 + $0x50] sm:$0xff]  ;;  %s1492_s27 = smov 107   ;;  %s1493_s28 = smov 108   ;;  %vm322_vm1 = vcmask 719872  }
   0x9   :  { %v74_v10 = vpack.c.bf16 %v57_v6, %v56_v5  ;;  %v94_v11 = vunpack.c.l.b16 %v75_v4  ;;  %v79_v12 = vpack.c.bf16 %v66_v9, %v65_v8  ;;  %v95_v18 = vunpack.c.h.b16 %v75_v4  ;;  %s1494_s29 = smov 126   ;;  %v60_v24 = vld [vmem:[#allocation2 + $0x20] sm:$0xff]  ;;  %v61_v25 = vld [vmem:[#allocation2 + $0x28] sm:$0xff]  ;;  %v70_v27 = vld [vmem:[#allocation2 + $0x70] sm:$0xff]  ;;  %s1495_s30 = smov 127  }
   0xa   :  { %v102_v13 = vunpack.c.l.b16 %v80_v7  ;;  %v103_v19 = vunpack.c.h.b16 %v80_v7  ;;  %v69_v26 = vld [vmem:[#allocation2 + $0x68] sm:$0xff]  ;;  %v76_v28 = vpack.c.bf16 %v61_v25, %v60_v24  ;;  %v62_v36 = vld [vmem:[#allocation2 + $0x30] sm:$0xff]  ;;  %v63_v37 = vld [vmem:[#allocation2 + $0x38] sm:$0xff]  ;;  %vm287_vm2 = vcmask 867328  }
   0xb   :  { %v92_v14 = vunpack.c.l.b16 %v74_v10  ;;  %v100_v15 = vunpack.c.l.b16 %v79_v12  ;;  %v93_v20 = vunpack.c.h.b16 %v74_v10  ;;  %v101_v21 = vunpack.c.h.b16 %v79_v12  ;;  %v71_v38 = vld [vmem:[#allocation2 + $0x78] sm:$0xff]  ;;  %v72_v39 = vld [vmem:[#allocation2 + $0x80] sm:$0xff]  ;;  %v73_v60 = vld [vmem:[#allocation2 + $0x88] sm:$0xff] }
   0xc   :  { %v1562_v16 = vpack.c.b16 %v102_v13, %v94_v11  ;;  %v1572_v22 = vpack.c.b16 %v103_v19, %v95_v18  ;;  %v81_v29 = vpack.c.bf16 %v70_v27, %v69_v26  ;;  %v96_v30 = vunpack.c.l.b16 %v76_v28  ;;  %v64_v59 = vld [vmem:[#allocation2 + $0x40] sm:$0xff] }
   0xd   :  { %v1564_v17 = vpack.c.b16 %v100_v15, %v92_v14  ;;  %v1574_v23 = vpack.c.b16 %v101_v21, %v93_v20  ;;  %v97_v33 = vunpack.c.h.b16 %v76_v28  ;;  %v77_v40 = vpack.c.bf16 %v63_v37, %v62_v36 }
   0xe   :  { %308 = vrot.lane.b32.xlu2 %v1562_v16, %s1488_s0  ;;  %343 = vrot.lane.b32.xlu0 %v1562_v16, %s1489_s24  ;;  %v104_v31 = vunpack.c.l.b16 %v81_v29  ;;  %v105_v34 = vunpack.c.h.b16 %v81_v29  ;;  %v82_v41 = vpack.c.bf16 %v72_v39, %v71_v38  ;;  %v78_v2 = vpack.c.bf16 %v64_v59, %v64_v59 }
   0xf   :  { %339 = vrot.lane.b32.xlu1 %v1564_v17, %s1489_s24  ;;  %v98_v42 = vunpack.c.l.b16 %v77_v40  ;;  %v99_v47 = vunpack.c.h.b16 %v77_v40  ;;  %v83_v3 = vpack.c.bf16 %v73_v60, %v73_v60  ;;  %vm252_vm3 = vcmask 875520  }
  0x10   :  { %v1624_v32 = vpack.c.b16 %v104_v31, %v96_v30  ;;  %v1632_v35 = vpack.c.b16 %v105_v34, %v97_v33  ;;  %v106_v43 = vunpack.c.l.b16 %v82_v41  ;;  %v107_v48 = vunpack.c.h.b16 %v82_v41 }
  0x11   :  { %v126_v5 = vunpack.c.l.b16 %v78_v2  ;;  %v127_v6 = vunpack.c.l.b16 %v83_v3  ;;  %vm392_vm4 = vcmask 703488   ;;  %vm217_vm5 = vcmask 883712  }
  0x12   :  { %v1648_v45 = vpack.c.b16 %v106_v43, %v98_v42  ;;  %v1666_v50 = vpack.c.b16 %v107_v48, %v99_v47  ;;  %vm182_vm6 = vcmask 1031168   ;;  %vm147_vm7 = vcmask 1039360  }
  0x13   :  { %v1707_v11 = vpack.c.b16 %v127_v6, %v126_v5  ;;  %vm422_vm8 = vcmask 130048  }
  0x16   :  { %310 = vrot.lane.b32.xlu2 %v1572_v22, %s1488_s0  ;;  %345 = vrot.lane.b32.xlu0 %v1572_v22, %s1489_s24 }
  0x17   :  { %341 = vrot.lane.b32.xlu1 %v1574_v23, %s1489_s24 }
  0x1e   :  { %273 = vrot.lane.b32.xlu2 %v1562_v16, %s1490_s25  ;;  %304 = vrot.lane.b32.xlu0 %v1564_v17, %s1488_s0 }
  0x1f   :  { %306 = vrot.lane.b32.xlu1 %v1574_v23, %s1488_s0 }
  0x26   :  { %271 = vrot.lane.b32.xlu2 %v1574_v23, %s1490_s25  ;;  %275 = vrot.lane.b32.xlu0 %v1572_v22, %s1490_s25 }
  0x27   :  { %269 = vrot.lane.b32.xlu1 %v1564_v17, %s1490_s25 }
  0x2e   :  { %374 = vrot.lane.b32.xlu2 %v1564_v17, %s1491_s26  ;;  %238 = vrot.lane.b32.xlu0 %v1562_v16, %s1492_s27 }
  0x2f   :  { %240 = vrot.lane.b32.xlu1 %v1572_v22, %s1492_s27 }
  0x36   :  { %236 = vrot.lane.b32.xlu2 %v1574_v23, %s1492_s27  ;;  %376 = vrot.lane.b32.xlu0 %v1574_v23, %s1491_s26 }
  0x37   :  { %234 = vrot.lane.b32.xlu1 %v1564_v17, %s1492_s27 }
  0x3e   :  { %199 = vrot.lane.b32.xlu2 %v1564_v17, %s1493_s28  ;;  %203 = vrot.lane.b32.xlu0 %v1562_v16, %s1493_s28 }
  0x3f   :  { %205 = vrot.lane.b32.xlu1 %v1572_v22, %s1493_s28 }
  0x46   :  { %170 = vrot.lane.b32.xlu2 %v1572_v22, %s1494_s29  ;;  %201 = vrot.lane.b32.xlu0 %v1574_v23, %s1493_s28 }
  0x47   :  { %168 = vrot.lane.b32.xlu1 %v1562_v16, %s1494_s29 }
  0x4e   :  { %166 = vrot.lane.b32.xlu2 %v1574_v23, %s1494_s29  ;;  %378 = vrot.lane.b32.xlu0 %v1562_v16, %s1491_s26 }
  0x4f   :  { %164 = vrot.lane.b32.xlu1 %v1564_v17, %s1494_s29 }
  0x56   :  { %347 = vrot.lane.b32.xlu2 %v1624_v32, %s1489_s24  ;;  %133 = vrot.lane.b32.xlu0 %v1562_v16, %s1495_s30 }
  0x57   :  { %135 = vrot.lane.b32.xlu1 %v1572_v22, %s1495_s30 }
  0x5e   :  { %349 = vrot.lane.b32.xlu2 %v1632_v35, %s1489_s24  ;;  %129 = vrot.lane.b32.xlu0 %v1564_v17, %s1495_s30 }
  0x5f   :  { %131 = vrot.lane.b32.xlu1 %v1574_v23, %s1495_s30 }
  0x66   :  { %277 = vrot.lane.b32.xlu2 %v1624_v32, %s1490_s25  ;;  %312 = vrot.lane.b32.xlu0 %v1624_v32, %s1488_s0 }
  0x67   :  { %314 = vrot.lane.b32.xlu1 %v1632_v35, %s1488_s0 }
  0x68   :  { %v1646_v44 = vpop.permute.xlu2 %308 }
  0x6e   :  { %242 = vrot.lane.b32.xlu2 %v1624_v32, %s1492_s27  ;;  %279 = vrot.lane.b32.xlu0 %v1632_v35, %s1490_s25 }
  0x6f   :  { %351 = vrot.lane.b32.xlu1 %v1648_v45, %s1489_s24 }
  0x70   :  { %v1656_v46 = vpop.permute.xlu2 %310 }
  0x71   :  { %v325_v26 = vsel %vm322_vm1, %v1646_v44, %v1656_v46 }
  0x76   :  { %316 = vrot.lane.b32.xlu2 %v1648_v45, %s1488_s0  ;;  %380 = vrot.lane.b32.xlu0 %v1572_v22, %s1491_s26 }
  0x77   :  { %244 = vrot.lane.b32.xlu1 %v1632_v35, %s1492_s27 }
  0x78   :  { %v1664_v49 = vpop.permute.xlu2 %273 }
  0x7e   :  { %209 = vrot.lane.b32.xlu2 %v1632_v35, %s1493_s28  ;;  %207 = vrot.lane.b32.xlu0 %v1624_v32, %s1493_s28 }
  0x7f   :  { %353 = vrot.lane.b32.xlu1 %v1666_v50, %s1489_s24 }
  0x80   :  { %v1674_v51 = vpop.permute.xlu0 %343  ;;  %v272_v52 = vpop.permute.xlu2 %271 }
  0x81   :  { %v340_v53 = vpop.permute.xlu1 %339  ;;  %v289_v4 = vsel %vm287_vm2, %v272_v52, %v1664_v49 }
  0x86   :  { %318 = vrot.lane.b32.xlu2 %v1666_v50, %s1488_s0  ;;  %281 = vrot.lane.b32.xlu0 %v1648_v45, %s1490_s25 }
  0x87   :  { %172 = vrot.lane.b32.xlu1 %v1624_v32, %s1494_s29 }
  0x88   :  { %v1682_v54 = vpop.permute.xlu0 %345  ;;  %v375_v55 = vpop.permute.xlu2 %374 }
  0x89   :  { %v342_v56 = vpop.permute.xlu1 %341  ;;  %v360_v25 = vsel %vm357_vm0, %v1674_v51, %v1682_v54 }
  0x8a   :  { %v358_v57 = vsel %vm357_vm0, %v340_v53, %v342_v56  ;;  %v359_v58 = vsel %vm357_vm0, %v342_v56, %v1674_v51 }
  0x8b   :  { %426 = vmatpush.bf16.msra.mxu0 %v358_v57  ;;  %452 = vmatpush.bf16.msra.mxu2 %v359_v58 }
  0x8e   :  { %174 = vrot.lane.b32.xlu2 %v1632_v35, %s1494_s29  ;;  %382 = vrot.lane.b32.xlu0 %v1624_v32, %s1491_s26 }
  0x8f   :  { %384 = vrot.lane.b32.xlu1 %v1632_v35, %s1491_s26 }
  0x90   :  { %v237_v61 = vpop.permute.xlu2 %236  ;;  %v305_v62 = vpop.permute.xlu0 %304 }
  0x91   :  { %v307_v63 = vpop.permute.xlu1 %306 }
  0x92   :  { %v323_v0 = vsel %vm322_vm1, %v305_v62, %v307_v63  ;;  %v324_v1 = vsel %vm322_vm1, %v307_v63, %v1646_v44 }
  0x93   :  { %427 = vmatpush.bf16.msra.mxu0 %v323_v0  ;;  %453 = vmatpush.bf16.msra.mxu2 %v324_v1 }
  0x96   :  { %283 = vrot.lane.b32.xlu2 %v1666_v50, %s1490_s25  ;;  %246 = vrot.lane.b32.xlu0 %v1648_v45, %s1492_s27 }
  0x97   :  { %137 = vrot.lane.b32.xlu1 %v1624_v32, %s1495_s30  ;;  %454 = vmatpush.bf16.msra.mxu2 %v289_v4 }
  0x98   :  { %v200_v7 = vpop.permute.xlu2 %199  ;;  %v1704_v8 = vpop.permute.xlu0 %275 }
  0x99   :  { %v270_v9 = vpop.permute.xlu1 %269  ;;  %v290_v30 = vsel %vm287_vm2, %v1664_v49, %v1704_v8  ;;  %v409_v49 = vld [vmem:[%s2375_s3] sm:$0xff] }
  0x9a   :  { %v288_v10 = vsel %vm287_vm2, %v270_v9, %v272_v52  ;;  %v418_v53 = vunpack.c.h.b16 %v409_v49  ;;  %v417_v63 = vunpack.c.l.b16 %v409_v49 }
  0x9b   :  { %428 = vmatpush.bf16.msra.mxu0 %v288_v10 }
  0x9c   :  { %v1789_v57 = vpack.c.b16 %v418_v53, %v418_v53  ;;  %v1807_v2 = vpack.c.b16 %v417_v63, %v417_v63 }
  0x9e   :  { %211 = vrot.lane.b32.xlu2 %v1648_v45, %s1493_s28  ;;  %355 = vrot.lane.b32.xlu0 %v1707_v11, %s1489_s24 }
  0x9f   :  { %139 = vrot.lane.b32.xlu1 %v1632_v35, %s1495_s30 }
  0xa0   :  { %v1715_v12 = vpop.permute.xlu2 %170  ;;  %v239_v13 = vpop.permute.xlu0 %238 }
  0xa1   :  { %v1717_v14 = vpop.permute.xlu1 %240  ;;  %v254_v15 = vsel %vm252_vm3, %v237_v61, %v239_v13 }
  0xa2   :  { %455 = vmatpush.bf16.msra.mxu2 %v254_v15  ;;  %v255_v31 = vsel %vm252_vm3, %v239_v13, %v1717_v14  ;;  %v410_v13 = vld [vmem:[%s2376_s4] sm:$0xff] }
  0xa6   :  { %176 = vrot.lane.b32.xlu2 %v1648_v45, %s1494_s29  ;;  %248 = vrot.lane.b32.xlu0 %v1666_v50, %s1492_s27 }
  0xa7   :  { %320 = vrot.lane.b32.xlu1 %v1707_v11, %s1488_s0 }
  0xa8   :  { %v167_v18 = vpop.permute.xlu2 %166  ;;  %v377_v19 = vpop.permute.xlu0 %376 }
  0xa9   :  { %v235_v20 = vpop.permute.xlu1 %234  ;;  %v393_v21 = vsel %vm392_vm4, %v375_v55, %v377_v19 }
  0xaa   :  { %v253_v24 = vsel %vm252_vm3, %v235_v20, %v237_v61  ;;  %446 = vmatpush.bf16.msra.mxu1 %v393_v21 }
  0xab   :  { %429 = vmatpush.bf16.msra.mxu0 %v253_v24 }
  0xad   :  { %1398 = vmatmul.msk.bf16.vlgmr.msra.gmra.mxu1 %vm422_vm8, %v1789_v57 }
  0xae   :  { %478 = vmatpush.bf16.msrb.mxu1 %v360_v25  ;;  %141 = vrot.lane.b32.xlu2 %v1648_v45, %s1495_s30 }
  0xaf   :  { %213 = vrot.lane.b32.xlu0 %v1666_v50, %s1493_s28  ;;  %285 = vrot.lane.b32.xlu1 %v1707_v11, %s1490_s25 }
  0xb0   :  { %v1740_v27 = vpop.permute.xlu2 %347  ;;  %v204_v28 = vpop.permute.xlu0 %203 }
  0xb1   :  { %v1742_v29 = vpop.permute.xlu1 %205  ;;  %v361_v15 = vsel %vm357_vm0, %v1682_v54, %v1740_v27 }
  0xb2   :  { %479 = vmatpush.bf16.msrb.mxu1 %v325_v26  ;;  %v220_v39 = vsel %vm217_vm5, %v204_v28, %v1742_v29 }
  0xb6   :  { %480 = vmatpush.bf16.msrb.mxu1 %v290_v30  ;;  %386 = vrot.lane.b32.xlu2 %v1648_v45, %s1491_s26 }
  0xb7   :  { %178 = vrot.lane.b32.xlu0 %v1666_v50, %s1494_s29  ;;  %250 = vrot.lane.b32.xlu1 %v1707_v11, %s1492_s27 }
  0xb8   :  { %v1755_v33 = vpop.permute.xlu2 %349  ;;  %v202_v34 = vpop.permute.xlu0 %201 }
  0xb9   :  { %v169_v36 = vpop.permute.xlu1 %168  ;;  %v218_v37 = vsel %vm217_vm5, %v200_v7, %v202_v34  ;;  %v219_v38 = vsel %vm217_vm5, %v202_v34, %v204_v28  ;;  %v362_v0 = vsel %vm357_vm0, %v1740_v27, %v1755_v33 }
  0xba   :  { %481 = vmatpush.bf16.msrb.mxu1 %v255_v31  ;;  %430 = vmatpush.bf16.msra.mxu0 %v218_v37  ;;  %v184_v40 = vsel %vm182_vm6, %v167_v18, %v169_v36  ;;  %v185_v41 = vsel %vm182_vm6, %v169_v36, %v1715_v12 }
  0xbb   :  { %456 = vmatpush.bf16.msra.mxu2 %v219_v38 }
  0xbe   :  { %482 = vmatpush.bf16.msrb.mxu1 %v220_v39  ;;  %180 = vrot.lane.b32.xlu2 %v1707_v11, %s1494_s29 }
  0xbf   :  { %143 = vrot.lane.b32.xlu0 %v1666_v50, %s1495_s30  ;;  %457 = vmatpush.bf16.msra.mxu2 %v184_v40 }
  0xc0   :  { %215 = vrot.lane.b32.xlu1 %v1707_v11, %s1493_s28  ;;  %v1768_v42 = vpop.permute.xlu2 %277  ;;  %v379_v43 = vpop.permute.xlu0 %378 }
  0xc1   :  { %v165_v44 = vpop.permute.xlu1 %164  ;;  %v394_v47 = vsel %vm392_vm4, %v377_v19, %v379_v43  ;;  %v1496_v19 = vmov 0   ;;  %v291_v26 = vsel %vm287_vm2, %v1704_v8, %v1768_v42 }
  0xc2   :  { %483 = vmatpush.bf16.msrb.mxu1 %v185_v41  ;;  %v183_v48 = vsel %vm182_vm6, %v165_v44, %v167_v18  ;;  %472 = vmatpush.bf16.msra.mxu3 %v394_v47 }
  0xc3   :  { %431 = vmatpush.bf16.msra.mxu0 %v183_v48  ;;  %1427 = vset.pattern.permute.xlu0 %v1496_v19 }
  0xc4   :  { %1428 = vset.pattern.permute.xlu2 %v1496_v19 }
  0xc5   :  { %1399 = vmatmul.msk.bf16.vlgmr.msra.gmra.mxu3 %vm422_vm8, %v1789_v57 }
  0xc6   :  { %390 = vrot.lane.b32.xlu2 %v1707_v11, %s1491_s26 }
  0xc7   :  { %388 = vrot.lane.b32.xlu0 %v1666_v50, %s1491_s26 }
  0xc8   :  { %145 = vrot.lane.b32.xlu1 %v1707_v11, %s1495_s30  ;;  %v1781_v51 = vpop.permute.xlu2 %242  ;;  %v134_v52 = vpop.permute.xlu0 %133 }
  0xc9   :  { %v1785_v55 = vpop.permute.xlu1 %135  ;;  %v256_v27 = vsel %vm252_vm3, %v1717_v14, %v1781_v51 }
  0xca   :  { %v150_v56 = vsel %vm147_vm7, %v134_v52, %v1785_v55 }
  0xcb   :  { %484 = vmatpush.bf16.msrb.mxu1 %v150_v56 }
  0xcf   :  { %485 = vmatpush.bf16.msrb.mxu1 %v1562_v16  ;;  %413 = vperm.xlu0 %1427, %v410_v13  }
  0xd0   :  { %v1796_v58 = vpop.permute.xlu2 %316  ;;  %v130_v59 = vpop.permute.xlu0 %129 }
  0xd1   :  { %v132_v60 = vpop.permute.xlu1 %131 }
  0xd2   :  { %v148_v61 = vsel %vm147_vm7, %v130_v59, %v132_v60  ;;  %v149_v62 = vsel %vm147_vm7, %v132_v60, %v134_v52  ;;  %486 = vmatmul.bf16.vlgmr.msrb.gmra.mxu1 %v1807_v2 }
  0xd3   :  { %432 = vmatpush.bf16.msra.mxu0 %v148_v61  ;;  %458 = vmatpush.bf16.msra.mxu2 %v149_v62 }
  0xd7   :  { %459 = vmatpush.bf16.msra.mxu2 %v1574_v23  ;;  %433 = vmatpush.bf16.msra.mxu0 %v1564_v17 }
  0xd8   :  { %v1805_v16 = vpop.permute.xlu2 %209  ;;  %v313_v1 = vpop.permute.xlu0 %312 }
  0xd9   :  { %v315_v3 = vpop.permute.xlu1 %314  ;;  %v326_v20 = vsel %vm322_vm1, %v1656_v46, %v313_v1 }
  0xda   :  { %v327_v4 = vsel %vm322_vm1, %v313_v1, %v315_v3  ;;  %460 = vmatmul.bf16.vlgmr.msra.gmra.mxu2 %v1807_v2  ;;  %434 = vmatmul.bf16.vlgmr.msra.gmra.mxu0 %v1807_v2 }
  0xdb   :  { %530 = vmatpush.bf16.msrb.mxu2 %v362_v0 }
  0xdf   :  { %531 = vmatpush.bf16.msrb.mxu2 %v327_v4 }
  0xe0   :  { %v1813_v23 = vpop.permute.xlu2 %318  ;;  %v280_v5 = vpop.permute.xlu0 %279 }
  0xe1   :  { %v352_v17 = vpop.permute.xlu1 %351  ;;  %v292_v6 = vsel %vm287_vm2, %v1768_v42, %v280_v5 }
  0xe2   :  { %v363_v39 = vsel %vm357_vm0, %v1755_v33, %v352_v17 }
  0xe3   :  { %532 = vmatpush.bf16.msrb.mxu2 %v292_v6 }
  0xe8   :  { %v1817_v7 = vpop.permute.xlu2 %174  ;;  %v381_v9 = vpop.permute.xlu0 %380 }
  0xe9   :  { %v245_v10 = vpop.permute.xlu1 %244  ;;  %v395_v11 = vsel %vm392_vm4, %v379_v43, %v381_v9 }
  0xea   :  { %498 = vmatpush.bf16.msrb.mxu3 %v395_v11  ;;  %v257_v18 = vsel %vm252_vm3, %v1781_v51, %v245_v10 }
  0xeb   :  { %533 = vmatpush.bf16.msrb.mxu2 %v257_v18 }
  0xed   :  { %1400 = vmatmul.msk.bf16.vlgmr.msrb.gmra.mxu3 %vm422_vm8, %v1789_v57 }
  0xee   :  { %504 = vmatpush.bf16.msra.mxu3 %v361_v15 }
  0xf0   :  { %v1832_v21 = vpop.permute.xlu2 %283  ;;  %v208_v54 = vpop.permute.xlu0 %207 }
  0xf1   :  { %v354_v24 = vpop.permute.xlu1 %353  ;;  %v222_v25 = vsel %vm217_vm5, %v208_v54, %v1805_v16  ;;  %v221_v31 = vsel %vm217_vm5, %v1742_v29, %v208_v54 }
  0xf2   :  { %505 = vmatpush.bf16.msra.mxu3 %v326_v20  ;;  %534 = vmatpush.bf16.msrb.mxu2 %v222_v25  ;;  %v364_v47 = vsel %vm357_vm0, %v352_v17, %v354_v24 }
  0xf6   :  { %506 = vmatpush.bf16.msra.mxu3 %v291_v26 }
  0xf8   :  { %v1842_v46 = vpop.permute.xlu2 %211  ;;  %v282_v28 = vpop.permute.xlu0 %281 }
  0xf9   :  { %v173_v30 = vpop.permute.xlu1 %172  ;;  %v293_v43 = vsel %vm287_vm2, %v280_v5, %v282_v28  ;;  %v223_v56 = vsel %vm217_vm5, %v1805_v16, %v1842_v46  ;;  %v294_v60 = vsel %vm287_vm2, %v282_v28, %v1832_v21 }
  0xfa   :  { %507 = vmatpush.bf16.msra.mxu3 %v256_v27  ;;  %v187_v34 = vsel %vm182_vm6, %v173_v30, %v1817_v7  ;;  %v186_v8 = vsel %vm182_vm6, %v1715_v12, %v173_v30  ;;  %v328_v12 = vsel %vm322_vm1, %v315_v3, %v1796_v58 }
  0xfb   :  { %535 = vmatpush.bf16.msrb.mxu2 %v187_v34 }
  0xfe   :  { %508 = vmatpush.bf16.msra.mxu3 %v221_v31 }
 0x100   :  { %v1850_v36 = vpop.permute.xlu2 %176  ;;  %v383_v14 = vpop.permute.xlu0 %382 }
 0x101   :  { %v385_v37 = vpop.permute.xlu1 %384  ;;  %v396_v38 = vsel %vm392_vm4, %v381_v9, %v383_v14  ;;  %v188_v59 = vsel %vm182_vm6, %v1817_v7, %v1850_v36 }
 0x102   :  { %509 = vmatpush.bf16.msra.mxu3 %v186_v8  ;;  %v397_v29 = vsel %vm392_vm4, %v383_v14, %v385_v37  ;;  %524 = vmatpush.bf16.msrb.mxu0 %v396_v38 }
 0x103   :  { %550 = vmatpush.bf16.msra.mxu1 %v397_v29 }
 0x105   :  { %1401 = vmatmul.msk.bf16.vlgmr.msrb.gmra.mxu0 %vm422_vm8, %v1789_v57 }
 0x106   :  { %556 = vmatpush.bf16.msra.mxu0 %v363_v39  ;;  %1402 = vmatmul.msk.bf16.vlgmr.msra.gmra.mxu1 %vm422_vm8, %v1789_v57 }
 0x108   :  { %v142_v40 = vpop.permute.xlu2 %141  ;;  %v247_v41 = vpop.permute.xlu0 %246 }
 0x109   :  { %v138_v42 = vpop.permute.xlu1 %137  ;;  %v258_v44 = vsel %vm252_vm3, %v245_v10, %v247_v41 }
 0x10a   :  { %557 = vmatpush.bf16.msra.mxu0 %v328_v12  ;;  %v151_v33 = vsel %vm147_vm7, %v1785_v55, %v138_v42 }
 0x10b   :  { %510 = vmatpush.bf16.msra.mxu3 %v151_v33 }
 0x10e   :  { %558 = vmatpush.bf16.msra.mxu0 %v293_v43 }
 0x10f   :  { %511 = vmatpush.bf16.msra.mxu3 %v1572_v22  ;;  %v329_v22 = vsel %vm322_vm1, %v1796_v58, %v1813_v23 }
 0x110   :  { %v387_v48 = vpop.permute.xlu2 %386  ;;  %v356_v49 = vpop.permute.xlu0 %355 }
 0x111   :  { %v398_v51 = vsel %vm392_vm4, %v385_v37, %v387_v48  ;;  %v365_v52 = vsel %vm357_vm0, %v354_v24, %v356_v49  ;;  %v140_v53 = vpop.permute.xlu1 %139 }
 0x112   :  { %559 = vmatpush.bf16.msra.mxu0 %v258_v44  ;;  %512 = vmatmul.bf16.vlgmr.msra.gmra.mxu3 %v1807_v2  ;;  %v152_v55 = vsel %vm147_vm7, %v138_v42, %v140_v53  ;;  %v153_v0 = vsel %vm147_vm7, %v140_v53, %v142_v40 }
 0x113   :  { %582 = vmatpush.bf16.msrb.mxu3 %v364_v47  ;;  %576 = vmatpush.bf16.msrb.mxu1 %v398_v51  ;;  %v1922_v51 = vld [vmem:[%s2373_s1] sm:$0xff] }
 0x114   :  { %536 = vmatpush.bf16.msrb.mxu2 %v152_v55  ;;  %v644_v55 = vperm.slane %v1922_v51, 0 }
 0x116   :  { %560 = vmatpush.bf16.msra.mxu0 %v223_v56  ;;  %1403 = vmatmul.msk.bf16.vlgmr.msrb.gmra.mxu1 %vm422_vm8, %v1789_v57 }
 0x117   :  { %583 = vmatpush.bf16.msrb.mxu3 %v329_v22  ;;  %608 = vmatpush.bf16.msra.mxu1 %v365_v52  ;;  %v645_v22 = vperm.slane %v1922_v51, 1 }
 0x118   :  { %537 = vmatpush.bf16.msrb.mxu2 %v1624_v32  ;;  %v249_v61 = vpop.permute.xlu0 %248  ;;  %v181_v17 = vpop.permute.xlu2 %180 }
 0x119   :  { %v321_v62 = vpop.permute.xlu1 %320  ;;  %v259_v58 = vsel %vm252_vm3, %v247_v41, %v249_v61 }
 0x11a   :  { %561 = vmatpush.bf16.msra.mxu0 %v188_v59  ;;  %v330_v63 = vsel %vm322_vm1, %v1813_v23, %v321_v62 }
 0x11b   :  { %584 = vmatpush.bf16.msrb.mxu3 %v294_v60  ;;  %538 = vmatmul.bf16.vlgmr.msrb.gmra.mxu2 %v1807_v2 }
 0x11c   :  { %609 = vmatpush.bf16.msra.mxu1 %v330_v63  ;;  %v646_v63 = vperm.slane %v1922_v51, 2 }
 0x11e   :  { %562 = vmatpush.bf16.msra.mxu0 %v153_v0 }
 0x11f   :  { %585 = vmatpush.bf16.msrb.mxu3 %v259_v58 }
 0x120   :  { %v391_v13 = vpop.permute.xlu2 %390 }
 0x121   :  { %v214_v32 = vpop.permute.xlu0 %213  ;;  %v286_v16 = vpop.permute.xlu1 %285 }
 0x122   :  { %563 = vmatpush.bf16.msra.mxu0 %v1632_v35  ;;  %v224_v1 = vsel %vm217_vm5, %v1842_v46, %v214_v32  ;;  %v295_v3 = vsel %vm287_vm2, %v1832_v21, %v286_v16 }
 0x123   :  { %586 = vmatpush.bf16.msrb.mxu3 %v224_v1  ;;  %610 = vmatpush.bf16.msra.mxu1 %v295_v3  ;;  %v647_v1 = vperm.slane %v1922_v51, 3 }
 0x125   :  { %564 = vmatmul.bf16.vlgmr.msra.gmra.mxu0 %v1807_v2 }
 0x129   :  { %v179_v4 = vpop.permute.xlu0 %178  ;;  %v251_v23 = vpop.permute.xlu1 %250 }
 0x12a   :  { %v189_v5 = vsel %vm182_vm6, %v1850_v36, %v179_v4  ;;  %v260_v35 = vsel %vm252_vm3, %v249_v61, %v251_v23  ;;  %v190_v11 = vsel %vm182_vm6, %v179_v4, %v181_v17 }
 0x12b   :  { %587 = vmatpush.bf16.msrb.mxu3 %v189_v5  ;;  %611 = vmatpush.bf16.msra.mxu1 %v260_v35  ;;  %v648_v35 = vperm.slane %v1922_v51, 4 }
 0x131   :  { %v144_v6 = vpop.permute.xlu0 %143 }
 0x132   :  { %v216_v7 = vpop.permute.xlu1 %215  ;;  %v154_v9 = vsel %vm147_vm7, %v142_v40, %v144_v6 }
 0x133   :  { %588 = vmatpush.bf16.msrb.mxu3 %v154_v9  ;;  %v225_v10 = vsel %vm217_vm5, %v214_v32, %v216_v7 }
 0x134   :  { %612 = vmatpush.bf16.msra.mxu1 %v225_v10 }
 0x137   :  { %589 = vmatpush.bf16.msrb.mxu3 %v1648_v45  ;;  %v448_v45 = vpop.f32.mrf.mxu1 }
 0x138   :  { %613 = vmatpush.bf16.msra.mxu1 %v190_v11 }
 0x139   :  { %v389_v15 = vpop.permute.xlu0 %388 }
 0x13a   :  { %v399_v18 = vsel %vm392_vm4, %v387_v48, %v389_v15  ;;  %v400_v19 = vsel %vm392_vm4, %v389_v15, %v391_v13  ;;  %v146_v20 = vpop.permute.xlu1 %145  ;;  %590 = vmatmul.bf16.vlgmr.msrb.gmra.mxu3 %v1807_v2 }
 0x13b   :  { %602 = vmatpush.bf16.msra.mxu2 %v399_v18  ;;  %v155_v21 = vsel %vm147_vm7, %v144_v6, %v146_v20  ;;  %628 = vmatpush.bf16.msrb.mxu0 %v400_v19  ;;  %v649_v18 = vperm.slane %v1922_v51, 5 }
 0x13c   :  { %614 = vmatpush.bf16.msra.mxu1 %v155_v21 }
 0x13e   :  { %1404 = vmatmul.msk.bf16.vlgmr.msra.gmra.mxu2 %vm422_vm8, %v1789_v57  ;;  %1405 = vmatmul.msk.bf16.vlgmr.msrb.gmra.mxu0 %vm422_vm8, %v1789_v57 }
 0x13f   :  { %v450_v24 = vpop.f32.mrf.mxu1 }
 0x140   :  { %615 = vmatpush.bf16.msra.mxu1 %v1666_v50 }
 0x141   :  { %v1914_v28 = vpop.permute.xlu0 %413 }
 0x143   :  { %616 = vmatmul.bf16.vlgmr.msra.gmra.mxu1 %v1807_v2 }
 0x148   :  { %v474_v54 = vpop.f32.mrf.mxu3 }
 0x14f   :  { %v487_v27 = vpop.f32.mrf.mxu1 }
 0x150   :  { %v476_v25 = vpop.f32.mrf.mxu3  ;;  %v488_v2 = vadd.f32 %v487_v27, %v1914_v28 }
 0x157   :  { %v435_v26 = vpop.f32.mrf.mxu0  ;;  %v489_v36 = vpop.f32.mrf.mxu1 }
 0x158   :  { %v436_v30 = vadd.f32 %v435_v26, %v1914_v28 }
 0x15a   :  { %v449_v8 = vadd.f32 %v448_v45, %v436_v30 }
 0x15c   :  { %v1925_v53 = vmax.f32 %v449_v8, 0.0 }
 0x15d   :  { %v461_v46 = vpop.f32.mrf.mxu2 }
 0x15e   :  { %v462_v31 = vadd.f32 %v461_v46, %v1914_v28  ;;  %v660_v61 = vmul.f32 %v644_v55, %v1925_v53 }
 0x15f   :  { %v437_v34 = vpop.f32.mrf.mxu0 }
 0x160   :  { %v475_v57 = vadd.f32 %v474_v54, %v462_v31  ;;  %v679_v3 = vmul.f32 %v660_v61, %v1925_v53  ;;  %v650_v34 = vperm.slane %v1922_v51, 6 }
 0x162   :  { %v1928_v56 = vmax.f32 %v475_v57, 0.0 }
 0x164   :  { %v661_v62 = vmul.f32 %v645_v22, %v1928_v56 }
 0x165   :  { %v463_v50 = vpop.f32.mrf.mxu2 }
 0x166   :  { %v680_v4 = vmul.f32 %v661_v62, %v1928_v56  ;;  %v670_v6 = vadd.f32 %v661_v62, %v660_v61 }
 0x168   :  { %v687_v10 = vadd.f32 %v680_v4, %v679_v3 }
 0x170   :  { %v500_v14 = vpop.f32.mrf.mxu3 }
 0x171   :  { %v501_v37 = vadd.f32 %v500_v14, %v488_v2  ;;  %v651_v2 = vperm.slane %v1922_v51, 7 }
 0x173   :  { %v1938_v58 = vmax.f32 %v501_v37, 0.0 }
 0x175   :  { %v662_v23 = vmul.f32 %v646_v63, %v1938_v58 }
 0x177   :  { %v681_v9 = vmul.f32 %v662_v23, %v1938_v58  ;;  %v671_v20 = vadd.f32 %v670_v6, %v662_v23 }
 0x178   :  { %v502_v38 = vpop.f32.mrf.mxu3 }
 0x179   :  { %v688_v45 = vadd.f32 %v687_v10, %v681_v9  ;;  %v668_v10 = vld [vmem:[%s2377_s5] sm:$0xff] }
 0x182   :  { %v526_v39 = vpop.f32.mrf.mxu0 }
 0x183   :  { %v552_v29 = vpop.f32.mrf.mxu1 }
 0x18a   :  { %v528_v12 = vpop.f32.mrf.mxu0 }
 0x18b   :  { %v554_v40 = vpop.f32.mrf.mxu1 }
 0x193   :  { %v578_v41 = vpop.f32.mrf.mxu1 }
 0x195   :  { %v513_v42 = vpop.f32.mrf.mxu3 }
 0x196   :  { %v514_v52 = vadd.f32 %v513_v42, %v1914_v28 }
 0x198   :  { %v527_v60 = vadd.f32 %v526_v39, %v514_v52 }
 0x19a   :  { %v1942_v16 = vmax.f32 %v527_v60, 0.0 }
 0x19b   :  { %v580_v33 = vpop.f32.mrf.mxu1 }
 0x19c   :  { %v663_v7 = vmul.f32 %v647_v1, %v1942_v16 }
 0x19d   :  { %v515_v44 = vpop.f32.mrf.mxu3 }
 0x19e   :  { %v539_v43 = vpop.f32.mrf.mxu2  ;;  %v682_v21 = vmul.f32 %v663_v7, %v1942_v16  ;;  %v672_v27 = vadd.f32 %v671_v20, %v663_v7 }
 0x19f   :  { %v540_v59 = vadd.f32 %v539_v43, %v1914_v28 }
 0x1a0   :  { %v689_v57 = vadd.f32 %v688_v45, %v682_v21  ;;  %v669_v21 = vld [vmem:[%s2378_s6] sm:$0xff] }
 0x1a1   :  { %v553_v0 = vadd.f32 %v552_v29, %v540_v59 }
 0x1a2   :  { %v565_v47 = vpop.f32.mrf.mxu0 }
 0x1a3   :  { %v566_v32 = vadd.f32 %v565_v47, %v1914_v28  ;;  %v1950_v5 = vmax.f32 %v553_v0, 0.0 }
 0x1a5   :  { %v579_v17 = vadd.f32 %v578_v41, %v566_v32  ;;  %v664_v13 = vmul.f32 %v648_v35, %v1950_v5 }
 0x1a6   :  { %v541_v48 = vpop.f32.mrf.mxu2 }
 0x1a7   :  { %v1960_v15 = vmax.f32 %v579_v17, 0.0  ;;  %v683_v54 = vmul.f32 %v664_v13, %v1950_v5  ;;  %v673_v8 = vadd.f32 %v672_v27, %v664_v13 }
 0x1a9   :  { %v665_v24 = vmul.f32 %v649_v18, %v1960_v15  ;;  %v690_v38 = vadd.f32 %v689_v57, %v683_v54 }
 0x1aa   :  { %v567_v49 = vpop.f32.mrf.mxu0 }
 0x1ab   :  { %v684_v14 = vmul.f32 %v665_v24, %v1960_v15 }
 0x1ad   :  { %v691_v43 = vadd.f32 %v690_v38, %v684_v14 }
 0x1bb   :  { %v630_v11 = vpop.f32.mrf.mxu0 }
 0x1bd   :  { %v591_v19 = vpop.f32.mrf.mxu3 }
 0x1be   :  { %v592_v25 = vadd.f32 %v591_v19, %v1914_v28 }
 0x1c0   :  { %v617_v26 = vpop.f32.mrf.mxu1 }
 0x1c1   :  { %v618_v46 = vadd.f32 %v617_v26, %v1914_v28  ;;  %v604_v30 = vpop.f32.mrf.mxu2  ;;  %v674_v28 = vadd.f32 %v673_v8, %v665_v24 }
 0x1c2   :  { %v605_v31 = vadd.f32 %v604_v30, %v592_v25 }
 0x1c3   :  { %v631_v36 = vadd.f32 %v630_v11, %v618_v46  ;;  %v632_v50 = vpop.f32.mrf.mxu0 }
 0x1c4   :  { %v640_v37 = vmax.f32 %v605_v31, 0.0 }
 0x1c5   :  { %v641_v39 = vmax.f32 %v631_v36, 0.0  ;;  %v593_v29 = vpop.f32.mrf.mxu3 }
 0x1c6   :  { %v666_v12 = vmul.f32 %v650_v34, %v640_v37 }
 0x1c7   :  { %v667_v40 = vmul.f32 %v651_v2, %v641_v39 }
 0x1c8   :  { %v619_v41 = vpop.f32.mrf.mxu1  ;;  %v675_v42 = vadd.f32 %v674_v28, %v666_v12  ;;  %v685_v33 = vmul.f32 %v666_v12, %v640_v37 }
 0x1c9   :  { %v606_v44 = vpop.f32.mrf.mxu2  ;;  %v686_v48 = vmul.f32 %v667_v40, %v641_v39 }
 0x1ca   :  { %v676_v47 = vadd.f32 %v675_v42, %v667_v40  ;;  %v692_v49 = vadd.f32 %v691_v43, %v685_v33 }
 0x1cc   :  { %677 = vadd.xlane.f32.xlu1 %v676_v47  ;;  %v693_v52 = vadd.f32 %v692_v49, %v686_v48 }
 0x1ce   :  { %694 = vadd.xlane.f32.xlu2 %v693_v52 }
 0x23f   :  { %v678_v59 = vpop.xlane.xlu1 %677 }
 0x240   :  { %v696_v60 = vmul.f32 0.001953125, %v678_v59 }
 0x241   :  { %v695_v61 = vpop.xlane.xlu2 %694 }
 0x242   :  { %v698_v62 = vmul.f32 %v696_v60, %v696_v60  ;;  %v697_v0 = vmul.f32 0.001953125, %v695_v61 }
 0x244   :  { %v699_v32 = vsub.f32 %v697_v0, %v698_v62 }
 0x246   :  { %v700_v3 = vmax.f32 %v699_v32, 0.0 }
 0x248   :  { %v701_v4 = vadd.f32 1e-05, %v700_v3 }
 0x24a   :  { %1429 = vrsqrt.f32 %v701_v4  ;;  %vm708_vm10 = vweird.f32 %v701_v4 }
 0x250   :  { %v1430_v23 = vpop.eup %1429 }
 0x251   :  { %v703_v17 = vmul.f32 %v1430_v23, %v701_v4  ;;  %vm709_vm9 = vweird.f32 %v1430_v23 }
 0x252   :  { %vm710_vm11 = vmor %vm708_vm10, %vm709_vm9 }
 0x253   :  { %v704_v6 = vmul.f32 %v1430_v23, %v703_v17 }
 0x255   :  { %v705_v7 = vmul.f32 0.5, %v704_v6 }
 0x257   :  { %v706_v9 = vsub.f32 1.5, %v705_v7 }
 0x259   :  { %v707_v11 = vmul.f32 %v1430_v23, %v706_v9 }
 0x25b   :  { %v711_v13 = vsel %vm710_vm11, %v1430_v23, %v707_v11 }
 0x25c   :  { %v712_v19 = vmul.f32 %v711_v13, %v668_v10 }
 0x25e   :  { %717 = vperm.xlu0 %1427, %v712_v19   ;;  %v713_v20 = vmul.f32 %v712_v19, %v696_v60 }
 0x260   :  { %v714_v45 = vsub.f32 %v669_v21, %v713_v20 }
 0x266   :  { %730 = vperm.xlu0 %1427, %v714_v45  }
 0x2d0   :  { %v718_v54 = vpop.permute.xlu0 %717 }
 0x2d1   :  { %v720_v24 = vmul.f32 %v718_v54, %v1925_v53  ;;  %v721_v25 = vmul.f32 %v718_v54, %v1928_v56  ;;  %v722_v26 = vmul.f32 %v718_v54, %v1938_v58  ;;  %v723_v27 = vmul.f32 %v718_v54, %v1942_v16 }
 0x2d2   :  { %v726_v46 = vmul.f32 %v718_v54, %v640_v37  ;;  %v727_v30 = vmul.f32 %v718_v54, %v641_v39  ;;  %v1497_v56 = vmov 0.0|0.0   ;;  %v724_v52 = vmul.f32 %v718_v54, %v1950_v5 }
 0x2d3   :  { %v766_v12 = vunpack.c.l.b16 %v1497_v56  ;;  %v767_v37 = vunpack.c.h.b16 %v1497_v56  ;;  %v725_v59 = vmul.f32 %v718_v54, %v1960_v15 }
 0x2d8   :  { %v731_v31 = vpop.permute.xlu0 %730 }
 0x2d9   :  { %v733_v8 = vadd.f32 %v731_v31, %v720_v24  ;;  %v734_v57 = vadd.f32 %v731_v31, %v721_v25  ;;  %v735_v36 = vadd.f32 %v731_v31, %v722_v26  ;;  %v736_v50 = vadd.f32 %v731_v31, %v723_v27 }
 0x2da   :  { %v739_v14 = vadd.f32 %v731_v31, %v726_v46  ;;  %v740_v38 = vadd.f32 %v731_v31, %v727_v30  ;;  %v737_v60 = vadd.f32 %v731_v31, %v724_v52  ;;  %v738_v61 = vadd.f32 %v731_v31, %v725_v59 }
 0x2db   :  { %v741_v29 = vmul.f32 %v733_v8, %v644_v55  ;;  %v742_v53 = vmul.f32 %v734_v57, %v645_v22  ;;  %v743_v39 = vmul.f32 %v735_v36, %v646_v63  ;;  %v744_v28 = vmul.f32 %v736_v50, %v647_v1 }
 0x2dc   :  { %v747_v58 = vmul.f32 %v739_v14, %v650_v34  ;;  %v748_v16 = vmul.f32 %v740_v38, %v651_v2  ;;  %v745_v62 = vmul.f32 %v737_v60, %v648_v35  ;;  %v746_v0 = vmul.f32 %v738_v61, %v649_v18 }
 0x2dd   :  { %v749_v40 = vpack.c.bf16 %v742_v53, %v741_v29  ;;  %v750_v43 = vpack.c.bf16 %v744_v28, %v743_v39 }
 0x2de   :  { %v752_v55 = vpack.c.bf16 %v748_v16, %v747_v58  ;;  %v751_v5 = vpack.c.bf16 %v746_v0, %v745_v62  ;;  %v1024_v62 = vld [vmem:[%s2379_s7] sm:$0xff] }
 0x2df   :  { %v759_v41 = vunpack.c.l.b16 %v749_v40  ;;  %v760_v42 = vunpack.c.h.b16 %v749_v40  ;;  %v761_v63 = vunpack.c.l.b16 %v750_v43  ;;  %v762_v48 = vunpack.c.h.b16 %v750_v43 }
 0x2e0   :  { %v765_v22 = vunpack.c.l.b16 %v752_v55  ;;  %v782_v33 = vunpack.c.h.b16 %v752_v55  ;;  %v763_v15 = vunpack.c.l.b16 %v751_v5  ;;  %v764_v51 = vunpack.c.h.b16 %v751_v5 }
 0x2e1   :  { %v1999_v44 = vpack.c.b16 %v766_v12, %v759_v41  ;;  %v2001_v34 = vpack.c.b16 %v767_v37, %v760_v42  ;;  %v2013_v1 = vpack.c.b16 %v766_v12, %v761_v63  ;;  %v2027_v49 = vpack.c.b16 %v767_v37, %v762_v48 }
 0x2e2   :  { %v2003_v47 = vpack.c.b16 %v766_v12, %v765_v22  ;;  %v2005_v2 = vpack.c.b16 %v767_v37, %v782_v33  ;;  %v2059_v32 = vpack.c.b16 %v766_v12, %v763_v15  ;;  %v2073_v35 = vpack.c.b16 %v767_v37, %v764_v51 }
 0x2e3   :  { %936 = vrot.lane.b32.xlu1 %v2001_v34, %s1488_s0  ;;  %934 = vrot.lane.b32.xlu2 %v1999_v44, %s1488_s0  ;;  %v1032_v5 = vunpack.c.l.b16 %v1024_v62 }
 0x2e4   :  { %964 = vrot.lane.b32.xlu0 %v1999_v44, %s1489_s24 }
 0x2eb   :  { %968 = vrot.lane.b32.xlu1 %v2013_v1, %s1489_s24  ;;  %876 = vrot.lane.b32.xlu2 %v2001_v34, %s1492_s27 }
 0x2ec   :  { %966 = vrot.lane.b32.xlu0 %v2001_v34, %s1489_s24 }
 0x2f3   :  { %846 = vrot.lane.b32.xlu1 %v2001_v34, %s1493_s28  ;;  %844 = vrot.lane.b32.xlu2 %v1999_v44, %s1493_s28 }
 0x2f4   :  { %904 = vrot.lane.b32.xlu0 %v1999_v44, %s1490_s25 }
 0x2fb   :  { %814 = vrot.lane.b32.xlu1 %v1999_v44, %s1494_s29  ;;  %940 = vrot.lane.b32.xlu2 %v2027_v49, %s1488_s0 }
 0x2fc   :  { %906 = vrot.lane.b32.xlu0 %v2001_v34, %s1490_s25 }
 0x303   :  { %910 = vrot.lane.b32.xlu1 %v2027_v49, %s1490_s25  ;;  %908 = vrot.lane.b32.xlu2 %v2013_v1, %s1490_s25 }
 0x304   :  { %874 = vrot.lane.b32.xlu0 %v1999_v44, %s1492_s27 }
 0x30b   :  { %878 = vrot.lane.b32.xlu1 %v2013_v1, %s1492_s27  ;;  %786 = vrot.lane.b32.xlu2 %v2001_v34, %s1495_s30 }
 0x30c   :  { %970 = vrot.lane.b32.xlu0 %v2027_v49, %s1489_s24 }
 0x313   :  { %996 = vrot.lane.b32.xlu1 %v2001_v34, %s1491_s26  ;;  %994 = vrot.lane.b32.xlu2 %v1999_v44, %s1491_s26 }
 0x314   :  { %938 = vrot.lane.b32.xlu0 %v2013_v1, %s1488_s0 }
 0x31b   :  { %972 = vrot.lane.b32.xlu1 %v2059_v32, %s1489_s24  ;;  %850 = vrot.lane.b32.xlu2 %v2027_v49, %s1493_s28 }
 0x31c   :  { %816 = vrot.lane.b32.xlu0 %v2001_v34, %s1494_s29 }
 0x323   :  { %820 = vrot.lane.b32.xlu1 %v2027_v49, %s1494_s29  ;;  %818 = vrot.lane.b32.xlu2 %v2013_v1, %s1494_s29 }
 0x324   :  { %784 = vrot.lane.b32.xlu0 %v1999_v44, %s1495_s30 }
 0x32b   :  { %788 = vrot.lane.b32.xlu1 %v2013_v1, %s1495_s30  ;;  %944 = vrot.lane.b32.xlu2 %v2073_v35, %s1488_s0 }
 0x32c   :  { %880 = vrot.lane.b32.xlu0 %v2027_v49, %s1492_s27 }
 0x333   :  { %914 = vrot.lane.b32.xlu1 %v2073_v35, %s1490_s25  ;;  %912 = vrot.lane.b32.xlu2 %v2059_v32, %s1490_s25 }
 0x334   :  { %848 = vrot.lane.b32.xlu0 %v2013_v1, %s1493_s28 }
 0x33b   :  { %998 = vrot.lane.b32.xlu1 %v2013_v1, %s1491_s26  ;;  %884 = vrot.lane.b32.xlu2 %v2073_v35, %s1492_s27 }
 0x33c   :  { %974 = vrot.lane.b32.xlu0 %v2073_v35, %s1489_s24 }
 0x33d   :  { %v935_v18 = vpop.permute.xlu2 %934 }
 0x343   :  { %978 = vrot.lane.b32.xlu1 %v2005_v2, %s1489_s24  ;;  %976 = vrot.lane.b32.xlu2 %v2003_v47, %s1489_s24 }
 0x344   :  { %942 = vrot.lane.b32.xlu0 %v2059_v32, %s1488_s0 }
 0x345   :  { %v2105_v3 = vpop.permute.xlu2 %876 }
 0x34b   :  { %946 = vrot.lane.b32.xlu1 %v2003_v47, %s1488_s0  ;;  %854 = vrot.lane.b32.xlu2 %v2073_v35, %s1493_s28 }
 0x34c   :  { %790 = vrot.lane.b32.xlu0 %v2027_v49, %s1495_s30 }
 0x34d   :  { %v845_v17 = vpop.permute.xlu2 %844 }
 0x353   :  { %824 = vrot.lane.b32.xlu1 %v2073_v35, %s1494_s29  ;;  %822 = vrot.lane.b32.xlu2 %v2059_v32, %s1494_s29 }
 0x354   :  { %882 = vrot.lane.b32.xlu0 %v2059_v32, %s1492_s27 }
 0x355   :  { %v937_v4 = vpop.permute.xlu1 %936  ;;  %v2121_v11 = vpop.permute.xlu2 %940 }
 0x356   :  { %v965_v23 = vpop.permute.xlu0 %964  ;;  %v950_v13 = vsel %vm322_vm1, %v935_v18, %v937_v4 }
 0x35b   :  { %792 = vrot.lane.b32.xlu1 %v2059_v32, %s1495_s30  ;;  %918 = vrot.lane.b32.xlu2 %v2005_v2, %s1490_s25 }
 0x35c   :  { %1000 = vrot.lane.b32.xlu0 %v2027_v49, %s1491_s26 }
 0x35d   :  { %v969_v6 = vpop.permute.xlu1 %968  ;;  %v909_v21 = vpop.permute.xlu2 %908 }
 0x35e   :  { %v967_v7 = vpop.permute.xlu0 %966 }
 0x35f   :  { %v980_v9 = vsel %vm357_vm0, %v965_v23, %v967_v7  ;;  %v981_v10 = vsel %vm357_vm0, %v967_v7, %v969_v6 }
 0x360   :  { %1040 = vmatpush.bf16.msrb.mxu2 %v980_v9  ;;  %1066 = vmatpush.bf16.msra.mxu0 %v981_v10 }
 0x363   :  { %888 = vrot.lane.b32.xlu1 %v2005_v2, %s1492_s27  ;;  %886 = vrot.lane.b32.xlu2 %v2003_v47, %s1492_s27 }
 0x364   :  { %852 = vrot.lane.b32.xlu0 %v2059_v32, %s1493_s28  ;;  %1041 = vmatpush.bf16.msrb.mxu2 %v950_v13 }
 0x365   :  { %v2130_v19 = vpop.permute.xlu1 %846  ;;  %v2145_v25 = vpop.permute.xlu2 %786 }
 0x366   :  { %v905_v20 = vpop.permute.xlu0 %904  ;;  %v860_v30 = vsel %vm217_vm5, %v845_v17, %v2130_v19  ;;  %v1033_v17 = vunpack.c.h.b16 %v1024_v62 }
 0x36b   :  { %856 = vrot.lane.b32.xlu1 %v2003_v47, %s1493_s28  ;;  %1004 = vrot.lane.b32.xlu2 %v2073_v35, %s1491_s26 }
 0x36c   :  { %948 = vrot.lane.b32.xlu0 %v2005_v2, %s1488_s0 }
 0x36d   :  { %v815_v45 = vpop.permute.xlu1 %814  ;;  %v995_v57 = vpop.permute.xlu2 %994 }
 0x36e   :  { %v907_v54 = vpop.permute.xlu0 %906 }
 0x36f   :  { %v920_v24 = vsel %vm287_vm2, %v905_v20, %v907_v54  ;;  %v921_v56 = vsel %vm287_vm2, %v907_v54, %v909_v21 }
 0x370   :  { %1042 = vmatpush.bf16.msrb.mxu2 %v920_v24 }
 0x373   :  { %828 = vrot.lane.b32.xlu1 %v2005_v2, %s1494_s29  ;;  %826 = vrot.lane.b32.xlu2 %v2003_v47, %s1494_s29 }
 0x374   :  { %916 = vrot.lane.b32.xlu0 %v2003_v47, %s1490_s25  ;;  %s1388_s25 = sshll.u32 %s2383_s11, 4  ;;  %s1389_s25 = int_to_ptr.hbm [resolvable:$true] %s1388_s25 }
 0x375   :  { %v2147_v26 = vpop.permute.xlu1 %910  ;;  %v2164_v53 = vpop.permute.xlu2 %850 }
 0x376   :  { %v875_v27 = vpop.permute.xlu0 %874  ;;  %v922_v28 = vsel %vm287_vm2, %v909_v21, %v2147_v26 }
 0x377   :  { %v890_v46 = vsel %vm252_vm3, %v875_v27, %v2105_v3 }
 0x378   :  { %1043 = vmatpush.bf16.msrb.mxu2 %v890_v46 }
 0x37b   :  { %1006 = vrot.lane.b32.xlu1 %v2003_v47, %s1491_s26  ;;  %798 = vrot.lane.b32.xlu2 %v2005_v2, %s1495_s30 }
 0x37c   :  { %794 = vrot.lane.b32.xlu0 %v2073_v35, %s1495_s30  ;;  %1044 = vmatpush.bf16.msrb.mxu2 %v860_v30 }
 0x37d   :  { %v879_v31 = vpop.permute.xlu1 %878  ;;  %v819_v40 = vpop.permute.xlu2 %818 }
 0x37e   :  { %v971_v8 = vpop.permute.xlu0 %970  ;;  %v891_v39 = vsel %vm252_vm3, %v2105_v3, %v879_v31 }
 0x37f   :  { %v982_v38 = vsel %vm357_vm0, %v969_v6, %v971_v8  ;;  %v2215_v6 = vpack.c.b16 %v1033_v17, %v1033_v17 }
 0x384   :  { %1002 = vrot.lane.b32.xlu0 %v2059_v32, %s1491_s26 }
 0x385   :  { %v997_v36 = vpop.permute.xlu1 %996  ;;  %v2187_v22 = vpop.permute.xlu2 %944 }
 0x386   :  { %v1010_v50 = vsel %vm392_vm4, %v995_v57, %v997_v36  ;;  %v939_v14 = vpop.permute.xlu0 %938 }
 0x387   :  { %1060 = vmatpush.bf16.msra.mxu3 %v1010_v50  ;;  %v951_v29 = vsel %vm322_vm1, %v937_v4, %v939_v14  ;;  %v952_v12 = vsel %vm322_vm1, %v939_v14, %v2121_v11  ;;  %v2209_v4 = vpack.c.b16 %v1032_v5, %v1032_v5 }
 0x388   :  { %1067 = vmatpush.bf16.msra.mxu0 %v951_v29 }
 0x38a   :  { %1406 = vmatmul.msk.bf16.vlgmr.msra.gmra.mxu3 %vm422_vm8, %v2215_v6 }
 0x38b   :  { %1092 = vmatpush.bf16.msrb.mxu3 %v982_v38 }
 0x38c   :  { %858 = vrot.lane.b32.xlu0 %v2005_v2, %s1493_s28  ;;  %1068 = vmatpush.bf16.msra.mxu0 %v921_v56 }
 0x38d   :  { %v2171_v58 = vpop.permute.xlu1 %972  ;;  %v913_v59 = vpop.permute.xlu2 %912 }
 0x38e   :  { %v817_v16 = vpop.permute.xlu0 %816  ;;  %v983_v18 = vsel %vm357_vm0, %v971_v8, %v2171_v58 }
 0x38f   :  { %1093 = vmatpush.bf16.msrb.mxu3 %v952_v12  ;;  %v830_v37 = vsel %vm182_vm6, %v815_v45, %v817_v16 }
 0x390   :  { %1045 = vmatpush.bf16.msrb.mxu2 %v830_v37  ;;  %1069 = vmatpush.bf16.msra.mxu0 %v891_v39 }
 0x393   :  { %1094 = vmatpush.bf16.msrb.mxu3 %v922_v28  ;;  %v1025_v28 = vld [vmem:[%s2380_s8] sm:$0xff] }
 0x394   :  { %796 = vrot.lane.b32.xlu0 %v2003_v47, %s1495_s30  ;;  %1028 = vperm.xlu2 %1428, %v1025_v28  }
 0x395   :  { %v2180_v55 = vpop.permute.xlu1 %820  ;;  %v2211_v23 = vpop.permute.xlu2 %884 }
 0x396   :  { %v785_v41 = vpop.permute.xlu0 %784 }
 0x397   :  { %v800_v42 = vsel %vm147_vm7, %v785_v41, %v2145_v25 }
 0x398   :  { %1046 = vmatpush.bf16.msrb.mxu2 %v800_v42 }
 0x39c   :  { %1008 = vrot.lane.b32.xlu0 %v2005_v2, %s1491_s26  ;;  %1047 = vmatpush.bf16.msrb.mxu2 %v1999_v44  ;;  %v831_v44 = vsel %vm182_vm6, %v817_v16, %v819_v40  ;;  %v832_v2 = vsel %vm182_vm6, %v819_v40, %v2180_v55 }
 0x39d   :  { %v789_v33 = vpop.permute.xlu1 %788  ;;  %v2226_v13 = vpop.permute.xlu2 %976 }
 0x39e   :  { %v881_v43 = vpop.permute.xlu0 %880  ;;  %v801_v3 = vsel %vm147_vm7, %v2145_v25, %v789_v33 }
 0x39f   :  { %v892_v63 = vsel %vm252_vm3, %v879_v31, %v881_v43  ;;  %1048 = vmatmul.bf16.vlgmr.msrb.gmra.mxu2 %v2209_v4 }
 0x3a0   :  { %1095 = vmatpush.bf16.msrb.mxu3 %v892_v63 }
 0x3a5   :  { %v2190_v48 = vpop.permute.xlu1 %914  ;;  %v2234_v45 = vpop.permute.xlu2 %854 }
 0x3a6   :  { %v849_v52 = vpop.permute.xlu0 %848 }
 0x3a7   :  { %v861_v60 = vsel %vm217_vm5, %v2130_v19, %v849_v52  ;;  %v862_v61 = vsel %vm217_vm5, %v849_v52, %v2164_v53 }
 0x3a8   :  { %1070 = vmatpush.bf16.msra.mxu0 %v861_v60  ;;  %1096 = vmatpush.bf16.msrb.mxu3 %v862_v61 }
 0x3ac   :  { %1071 = vmatpush.bf16.msra.mxu0 %v831_v44  ;;  %1097 = vmatpush.bf16.msrb.mxu3 %v832_v2 }
 0x3ad   :  { %v999_v0 = vpop.permute.xlu1 %998  ;;  %v823_v27 = vpop.permute.xlu2 %822 }
 0x3ae   :  { %v1011_v15 = vsel %vm392_vm4, %v997_v36, %v999_v0  ;;  %v2203_v51 = vpop.permute.xlu0 %974  ;;  %v924_v36 = vsel %vm287_vm2, %v913_v59, %v2190_v48  ;;  %v833_v14 = vsel %vm182_vm6, %v2180_v55, %v823_v27 }
 0x3af   :  { %1086 = vmatpush.bf16.msrb.mxu1 %v1011_v15  ;;  %v984_v30 = vsel %vm357_vm0, %v2171_v58, %v2203_v51  ;;  %v985_v52 = vsel %vm357_vm0, %v2203_v51, %v2226_v13 }
 0x3b0   :  { %1072 = vmatpush.bf16.msra.mxu0 %v801_v3 }
 0x3b2   :  { %1407 = vmatmul.msk.bf16.vlgmr.msrb.gmra.mxu1 %vm422_vm8, %v2215_v6 }
 0x3b3   :  { %1118 = vmatpush.bf16.msra.mxu1 %v983_v18 }
 0x3b4   :  { %1073 = vmatpush.bf16.msra.mxu0 %v2001_v34  ;;  %v923_v34 = vsel %vm287_vm2, %v2147_v26, %v913_v59 }
 0x3b5   :  { %v2217_v7 = vpop.permute.xlu1 %978  ;;  %v919_v50 = vpop.permute.xlu2 %918 }
 0x3b6   :  { %v943_v9 = vpop.permute.xlu0 %942  ;;  %v986_v59 = vsel %vm357_vm0, %v2226_v13, %v2217_v7 }
 0x3b7   :  { %v953_v10 = vsel %vm322_vm1, %v2121_v11, %v943_v9  ;;  %1074 = vmatmul.bf16.vlgmr.msra.gmra.mxu0 %v2209_v4 }
 0x3b8   :  { %1119 = vmatpush.bf16.msra.mxu1 %v953_v10 }
 0x3bc   :  { %1120 = vmatpush.bf16.msra.mxu1 %v923_v34 }
 0x3bd   :  { %v2230_v19 = vpop.permute.xlu1 %946  ;;  %v887_v58 = vpop.permute.xlu2 %886 }
 0x3be   :  { %v791_v20 = vpop.permute.xlu0 %790  ;;  %v895_v62 = vsel %vm252_vm3, %v2211_v23, %v887_v58 }
 0x3bf   :  { %v802_v21 = vsel %vm147_vm7, %v789_v33, %v791_v20 }
 0x3c0   :  { %1098 = vmatpush.bf16.msrb.mxu3 %v802_v21 }
 0x3c4   :  { %1099 = vmatpush.bf16.msrb.mxu3 %v2013_v1  ;;  %v954_v1 = vsel %vm322_vm1, %v943_v9, %v2187_v22 }
 0x3c5   :  { %v2236_v11 = vpop.permute.xlu1 %824  ;;  %v1005_v40 = vpop.permute.xlu2 %1004 }
 0x3c6   :  { %v883_v54 = vpop.permute.xlu0 %882  ;;  %v834_v16 = vsel %vm182_vm6, %v823_v27, %v2236_v11 }
 0x3c7   :  { %v893_v24 = vsel %vm252_vm3, %v881_v43, %v883_v54  ;;  %1100 = vmatmul.bf16.vlgmr.msrb.gmra.mxu3 %v2209_v4  ;;  %v894_v38 = vsel %vm252_vm3, %v883_v54, %v2211_v23 }
 0x3c8   :  { %1121 = vmatpush.bf16.msra.mxu1 %v893_v24 }
 0x3cd   :  { %v793_v25 = vpop.permute.xlu1 %792  ;;  %v827_v5 = vpop.permute.xlu2 %826 }
 0x3ce   :  { %v1001_v26 = vpop.permute.xlu0 %1000  ;;  %v803_v12 = vsel %vm147_vm7, %v791_v20, %v793_v25 }
 0x3cf   :  { %v1012_v46 = vsel %vm392_vm4, %v999_v0, %v1001_v26 }
 0x3d0   :  { %1112 = vmatpush.bf16.msra.mxu2 %v1012_v46 }
 0x3d3   :  { %1408 = vmatmul.msk.bf16.vlgmr.msra.gmra.mxu2 %vm422_vm8, %v2215_v6 }
 0x3d4   :  { %1144 = vmatpush.bf16.msrb.mxu2 %v984_v30 }
 0x3d5   :  { %v889_v31 = vpop.permute.xlu1 %888  ;;  %v799_v23 = vpop.permute.xlu2 %798 }
 0x3d6   :  { %v853_v8 = vpop.permute.xlu0 %852  ;;  %v896_v0 = vsel %vm252_vm3, %v887_v58, %v889_v31 }
 0x3d7   :  { %v863_v57 = vsel %vm217_vm5, %v2164_v53, %v853_v8  ;;  %v864_v53 = vsel %vm217_vm5, %v853_v8, %v2234_v45 }
 0x3d8   :  { %1145 = vmatpush.bf16.msrb.mxu2 %v954_v1  ;;  %1122 = vmatpush.bf16.msra.mxu1 %v863_v57 }
 0x3dc   :  { %1146 = vmatpush.bf16.msrb.mxu2 %v924_v36  ;;  %1123 = vmatpush.bf16.msra.mxu1 %v833_v14 }
 0x3dd   :  { %v857_v29 = vpop.permute.xlu1 %856 }
 0x3de   :  { %v949_v56 = vpop.permute.xlu0 %948  ;;  %v865_v15 = vsel %vm217_vm5, %v2234_v45, %v857_v29 }
 0x3df   :  { %v956_v60 = vsel %vm322_vm1, %v2230_v19, %v949_v56  ;;  %v1222_v56 = vld [vmem:[%s2374_s2] sm:$0xff] }
 0x3e0   :  { %1147 = vmatpush.bf16.msrb.mxu2 %v894_v38  ;;  %1124 = vmatpush.bf16.msra.mxu1 %v803_v12  ;;  %v1225_v58 = vperm.slane %v1222_v56, 1 }
 0x3e4   :  { %1148 = vmatpush.bf16.msrb.mxu2 %v864_v53  ;;  %1125 = vmatpush.bf16.msra.mxu1 %v2027_v49  ;;  %v1224_v53 = vperm.slane %v1222_v56, 0 }
 0x3e5   :  { %v829_v37 = vpop.permute.xlu1 %828 }
 0x3e6   :  { %v917_v39 = vpop.permute.xlu0 %916  ;;  %v836_v18 = vsel %vm182_vm6, %v827_v5, %v829_v37 }
 0x3e7   :  { %1126 = vmatmul.bf16.vlgmr.msra.gmra.mxu1 %v2209_v4  ;;  %v925_v44 = vsel %vm287_vm2, %v2190_v48, %v917_v39  ;;  %v926_v2 = vsel %vm287_vm2, %v917_v39, %v919_v50  ;;  %v835_v48 = vsel %vm182_vm6, %v2236_v11, %v827_v5  ;;  %v1226_v39 = vperm.slane %v1222_v56, 2 }
 0x3e8   :  { %1149 = vmatpush.bf16.msrb.mxu2 %v834_v16 }
 0x3ed   :  { %v1007_v55 = vpop.permute.xlu1 %1006 }
 0x3ee   :  { %v1015_v41 = vsel %vm392_vm4, %v1005_v40, %v1007_v55  ;;  %v795_v42 = vpop.permute.xlu0 %794  ;;  %v1029_v54 = vpop.permute.xlu2 %1028 }
 0x3ef   :  { %v804_v49 = vsel %vm147_vm7, %v793_v25, %v795_v42  ;;  %1190 = vmatpush.bf16.msrb.mxu1 %v1015_v41 }
 0x3f0   :  { %1150 = vmatpush.bf16.msrb.mxu2 %v804_v49 }
 0x3f4   :  { %1151 = vmatpush.bf16.msrb.mxu2 %v2059_v32  ;;  %v955_v32 = vsel %vm322_vm1, %v2187_v22, %v2230_v19 }
 0x3f6   :  { %v1003_v33 = vpop.permute.xlu0 %1002 }
 0x3f7   :  { %v1013_v43 = vsel %vm392_vm4, %v1001_v26, %v1003_v33  ;;  %v1014_v63 = vsel %vm392_vm4, %v1003_v33, %v1005_v40  ;;  %1152 = vmatmul.bf16.vlgmr.msrb.gmra.mxu2 %v2209_v4  ;;  %1411 = vmatmul.msk.bf16.vlgmr.msrb.gmra.mxu1 %vm422_vm8, %v2215_v6 }
 0x3f8   :  { %1138 = vmatpush.bf16.msrb.mxu0 %v1013_v43  ;;  %1164 = vmatpush.bf16.msra.mxu3 %v1014_v63 }
 0x3fb   :  { %1409 = vmatmul.msk.bf16.vlgmr.msrb.gmra.mxu0 %vm422_vm8, %v2215_v6  ;;  %1410 = vmatmul.msk.bf16.vlgmr.msra.gmra.mxu3 %vm422_vm8, %v2215_v6 }
 0x3fc   :  { %1170 = vmatpush.bf16.msra.mxu0 %v985_v52  ;;  %1196 = vmatpush.bf16.msrb.mxu3 %v986_v59  ;;  %v1228_v52 = vperm.slane %v1222_v56, 4 }
 0x3fe   :  { %v859_v61 = vpop.permute.xlu0 %858 }
 0x3ff   :  { %v866_v51 = vsel %vm217_vm5, %v857_v29, %v859_v61  ;;  %v1289_v29 = vld [vmem:[#allocation2] sm:$0xff] }
 0x400   :  { %1171 = vmatpush.bf16.msra.mxu0 %v955_v32  ;;  %1197 = vmatpush.bf16.msrb.mxu3 %v956_v60 }
 0x401   :  { %1329 = vrot.lane.b32.xlu2 %v1289_v29, %s1491_s26 }
 0x404   :  { %1172 = vmatpush.bf16.msra.mxu0 %v925_v44  ;;  %1198 = vmatpush.bf16.msrb.mxu3 %v926_v2  ;;  %v1229_v44 = vperm.slane %v1222_v56, 5 }
 0x406   :  { %v797_v22 = vpop.permute.xlu0 %796 }
 0x407   :  { %v805_v7 = vsel %vm147_vm7, %v795_v42, %v797_v22  ;;  %v806_v9 = vsel %vm147_vm7, %v797_v22, %v799_v23  ;;  %v1227_v42 = vperm.slane %v1222_v56, 3 }
 0x408   :  { %1173 = vmatpush.bf16.msra.mxu0 %v895_v62  ;;  %1199 = vmatpush.bf16.msrb.mxu3 %v896_v0 }
 0x40c   :  { %1174 = vmatpush.bf16.msra.mxu0 %v865_v15  ;;  %1200 = vmatpush.bf16.msrb.mxu3 %v866_v51 }
 0x40d   :  { %v1062_v19 = vpop.f32.mrf.mxu3 }
 0x40e   :  { %v1009_v3 = vpop.permute.xlu0 %1008 }
 0x40f   :  { %v1016_v17 = vsel %vm392_vm4, %v1007_v55, %v1009_v3 }
 0x410   :  { %1175 = vmatpush.bf16.msra.mxu0 %v835_v48  ;;  %1201 = vmatpush.bf16.msrb.mxu3 %v836_v18 }
 0x411   :  { %1216 = vmatpush.bf16.msra.mxu2 %v1016_v17 }
 0x414   :  { %1176 = vmatpush.bf16.msra.mxu0 %v805_v7  ;;  %1202 = vmatpush.bf16.msrb.mxu3 %v806_v9  ;;  %v1230_v9 = vperm.slane %v1222_v56, 6 }
 0x415   :  { %1412 = vmatmul.msk.bf16.vlgmr.msra.gmra.mxu2 %vm422_vm8, %v2215_v6  ;;  %v1064_v11 = vpop.f32.mrf.mxu3 }
 0x418   :  { %1177 = vmatpush.bf16.msra.mxu0 %v2073_v35  ;;  %1203 = vmatpush.bf16.msrb.mxu3 %v2003_v47 }
 0x41b   :  { %1178 = vmatmul.bf16.vlgmr.msra.gmra.mxu0 %v2209_v4  ;;  %1204 = vmatmul.bf16.vlgmr.msrb.gmra.mxu3 %v2209_v4 }
 0x422   :  { %v1049_v13 = vpop.f32.mrf.mxu2 }
 0x423   :  { %v1050_v24 = vadd.f32 %v1049_v13, %v1029_v54  ;;  %v1290_v13 = vld [vmem:[#allocation2 + $0x8] sm:$0xff] }
 0x424   :  { %1331 = vrot.lane.b32.xlu2 %v1290_v13, %s1491_s26 }
 0x425   :  { %v2310_v26 = vadd.f32 %v1062_v19, %v1050_v24 }
 0x427   :  { %v1238_v28 = vmul.f32 %v1224_v53, %v2310_v26 }
 0x429   :  { %v1255_v33 = vmul.f32 %v1238_v28, %v2310_v26 }
 0x42a   :  { %v1051_v21 = vpop.f32.mrf.mxu2 }
 0x42f   :  { %v1088_v10 = vpop.f32.mrf.mxu1 }
 0x434   :  { %v1075_v34 = vpop.f32.mrf.mxu0 }
 0x435   :  { %v1076_v25 = vadd.f32 %v1075_v34, %v1029_v54 }
 0x437   :  { %v1090_v20 = vpop.f32.mrf.mxu1  ;;  %v2312_v35 = vadd.f32 %v1088_v10, %v1076_v25 }
 0x439   :  { %v1239_v40 = vmul.f32 %v1225_v58, %v2312_v35 }
 0x43b   :  { %v1256_v43 = vmul.f32 %v1239_v40, %v2312_v35  ;;  %v1247_v60 = vadd.f32 %v1239_v40, %v1238_v28  ;;  %v1245_v40 = vld [vmem:[%s2381_s9] sm:$0xff]  ;;  %s1498_s9 = smov [#allocation5]  }
 0x43c   :  { %v1077_v45 = vpop.f32.mrf.mxu0 }
 0x43d   :  { %v1262_v0 = vadd.f32 %v1256_v43, %v1255_v33  ;;  %v1246_v43 = vld [vmem:[%s2382_s10] sm:$0xff]  ;;  %s1386_s10 = sshll.u32 %s1498_s9, 4  ;;  %s1387_s10 = int_to_ptr.vmem [resolvable:$true] %s1386_s10 }
 0x44a   :  { %v1101_v6 = vpop.f32.mrf.mxu3 }
 0x44b   :  { %v1102_v12 = vadd.f32 %v1101_v6, %v1029_v54 }
 0x452   :  { %v1103_v47 = vpop.f32.mrf.mxu3 }
 0x456   :  { %v1114_v27 = vpop.f32.mrf.mxu2 }
 0x457   :  { %v2318_v37 = vadd.f32 %v1114_v27, %v1102_v12 }
 0x459   :  { %v1240_v49 = vmul.f32 %v1226_v39, %v2318_v37 }
 0x45b   :  { %v1257_v62 = vmul.f32 %v1240_v49, %v2318_v37  ;;  %v1248_v15 = vadd.f32 %v1247_v60, %v1240_v49 }
 0x45d   :  { %v1263_v18 = vadd.f32 %v1262_v0, %v1257_v62 }
 0x45e   :  { %v1116_v46 = vpop.f32.mrf.mxu2 }
 0x464   :  { %v1127_v4 = vpop.f32.mrf.mxu1 }
 0x465   :  { %v1128_v16 = vadd.f32 %v1127_v4, %v1029_v54  ;;  %v1294_v4 = vld [vmem:[#allocation2 + $0x28] sm:$0xff] }
 0x46c   :  { %v1129_v30 = vpop.f32.mrf.mxu1 }
 0x46d   :  { %v1292_v30 = vld [vmem:[#allocation2 + $0x18] sm:$0xff] }
 0x474   :  { %v1192_v1 = vpop.f32.mrf.mxu1 }
 0x478   :  { %v1140_v31 = vpop.f32.mrf.mxu0 }
 0x479   :  { %v2322_v41 = vadd.f32 %v1140_v31, %v1128_v16  ;;  %v1293_v31 = vld [vmem:[#allocation2 + $0x20] sm:$0xff] }
 0x47a   :  { %v1153_v8 = vpop.f32.mrf.mxu2 }
 0x47b   :  { %v1154_v55 = vadd.f32 %v1153_v8, %v1029_v54  ;;  %v1241_v32 = vmul.f32 %v1227_v42, %v2322_v41  ;;  %v1295_v8 = vld [vmem:[#allocation2 + $0x30] sm:$0xff] }
 0x47c   :  { %v1194_v57 = vpop.f32.mrf.mxu1 }
 0x47d   :  { %v1258_v51 = vmul.f32 %v1241_v32, %v2322_v41  ;;  %v1249_v23 = vadd.f32 %v1248_v15, %v1241_v32  ;;  %v1330_v32 = vpop.permute.xlu2 %1329 }
 0x47e   :  { %v1166_v36 = vpop.f32.mrf.mxu3 }
 0x47f   :  { %v2327_v63 = vadd.f32 %v1166_v36, %v1154_v55  ;;  %v1264_v34 = vadd.f32 %v1263_v18, %v1258_v51 }
 0x480   :  { %v1142_v50 = vpop.f32.mrf.mxu0 }
 0x481   :  { %v1242_v5 = vmul.f32 %v1228_v52, %v2327_v63 }
 0x482   :  { %v1155_v14 = vpop.f32.mrf.mxu2 }
 0x483   :  { %v1259_v17 = vmul.f32 %v1242_v5, %v2327_v63  ;;  %v1250_v45 = vadd.f32 %v1249_v23, %v1242_v5 }
 0x485   :  { %v1265_v11 = vadd.f32 %v1264_v34, %v1259_v17  ;;  %v1332_v60 = vpop.permute.xlu2 %1331 }
 0x486   :  { %v1168_v38 = vpop.f32.mrf.mxu3  ;;  %v1346_v5 = vsel %vm392_vm4, %v1330_v32, %v1332_v60 }
 0x498   :  { %v1179_v59 = vpop.f32.mrf.mxu0  ;;  %v1218_v2 = vpop.f32.mrf.mxu2 }
 0x499   :  { %v1180_v61 = vadd.f32 %v1179_v59, %v1029_v54  ;;  %v1296_v59 = vld [vmem:[#allocation2 + $0x38] sm:$0xff] }
 0x49b   :  { %v2332_v22 = vadd.f32 %v1192_v1, %v1180_v61  ;;  %v1291_v1 = vld [vmem:[#allocation2 + $0x10] sm:$0xff] }
 0x49c   :  { %1333 = vrot.lane.b32.xlu2 %v1291_v1, %s1491_s26 }
 0x49d   :  { %v1243_v48 = vmul.f32 %v1229_v44, %v2332_v22 }
 0x49e   :  { %v1205_v3 = vpop.f32.mrf.mxu3 }
 0x49f   :  { %v1206_v7 = vadd.f32 %v1205_v3, %v1029_v54  ;;  %v1260_v19 = vmul.f32 %v1243_v48, %v2332_v22  ;;  %v1251_v25 = vadd.f32 %v1250_v45, %v1243_v48 }
 0x4a0   :  { %v1181_v10 = vpop.f32.mrf.mxu0  ;;  %v1220_v21 = vpop.f32.mrf.mxu2 }
 0x4a1   :  { %v2338_v20 = vadd.f32 %v1218_v2, %v1206_v7  ;;  %v1266_v54 = vadd.f32 %v1265_v11, %v1260_v19 }
 0x4a3   :  { %v1244_v24 = vmul.f32 %v1230_v9, %v2338_v20 }
 0x4a4   :  { %1337 = vrot.lane.b32.xlu2 %v1293_v31, %s1491_s26 }
 0x4a5   :  { %v1252_v6 = vadd.f32 %v1251_v25, %v1244_v24  ;;  %v1261_v47 = vmul.f32 %v1244_v24, %v2338_v20 }
 0x4a6   :  { %v1207_v27 = vpop.f32.mrf.mxu3 }
 0x4a7   :  { %1253 = vadd.xlane.f32.xlu1 %v1252_v6  ;;  %v1267_v46 = vadd.f32 %v1266_v54, %v1261_v47 }
 0x4a9   :  { %1268 = vadd.xlane.f32.xlu0 %v1267_v46 }
 0x4ac   :  { %1341 = vrot.lane.b32.xlu2 %v1295_v8, %s1491_s26 }
 0x4bd   :  { %1339 = vrot.lane.b32.xlu0 %v1294_v4, %s1491_s26 }
 0x4c0   :  { %1335 = vrot.lane.b32.xlu1 %v1292_v30, %s1491_s26 }
 0x4f6   :  { %v1334_v61 = vpop.permute.xlu2 %1333 }
 0x4f7   :  { %v1347_v15 = vsel %vm392_vm4, %v1332_v60, %v1334_v61 }
 0x4fe   :  { %v1338_v44 = vpop.permute.xlu2 %1337 }
 0x506   :  { %v1342_v2 = vpop.permute.xlu2 %1341 }
 0x51a   :  { %v1254_v57 = vpop.xlane.xlu1 %1253 }
 0x51b   :  { %v1270_v36 = vmul.f32 0.001953125, %v1254_v57 }
 0x51c   :  { %v1269_v50 = vpop.xlane.xlu0 %1268 }
 0x51d   :  { %v1272_v14 = vmul.f32 %v1270_v36, %v1270_v36  ;;  %v1271_v38 = vmul.f32 0.001953125, %v1269_v50 }
 0x51f   :  { %v1273_v29 = vsub.f32 %v1271_v38, %v1272_v14 }
 0x521   :  { %v1274_v56 = vmax.f32 %v1273_v29, 0.0 }
 0x523   :  { %v1275_v12 = vadd.f32 1e-05, %v1274_v56 }
 0x525   :  { %1431 = vrsqrt.f32 %v1275_v12  ;;  %vm1282_vm13 = vweird.f32 %v1275_v12 }
 0x52b   :  { %v1432_v53 = vpop.eup %1431 }
 0x52c   :  { %v1277_v58 = vmul.f32 %v1432_v53, %v1275_v12  ;;  %vm1283_vm12 = vweird.f32 %v1432_v53 }
 0x52d   :  { %vm1284_vm14 = vmor %vm1282_vm13, %vm1283_vm12 }
 0x52e   :  { %v1278_v16 = vmul.f32 %v1432_v53, %v1277_v58 }
 0x52f   :  { %v1340_v51 = vpop.permute.xlu0 %1339 }
 0x530   :  { %v1279_v39 = vmul.f32 0.5, %v1278_v16 }
 0x532   :  { %v1280_v28 = vsub.f32 1.5, %v1279_v39  ;;  %v1336_v0 = vpop.permute.xlu1 %1335 }
 0x533   :  { %v1348_v17 = vsel %vm392_vm4, %v1334_v61, %v1336_v0  ;;  %v1349_v7 = vsel %vm392_vm4, %v1336_v0, %v1338_v44 }
 0x534   :  { %v1281_v55 = vmul.f32 %v1432_v53, %v1280_v28 }
 0x536   :  { %v1285_v42 = vsel %vm1284_vm14, %v1432_v53, %v1281_v55 }
 0x537   :  { %v1286_v49 = vmul.f32 %v1285_v42, %v1245_v40 }
 0x539   :  { %1299 = vperm.xlu2 %1428, %v1286_v49   ;;  %v1287_v33 = vmul.f32 %v1286_v49, %v1270_v36 }
 0x53b   :  { %v1288_v52 = vsub.f32 %v1246_v43, %v1287_v33 }
 0x541   :  { %1311 = vperm.xlu2 %1428, %v1288_v52  }
 0x549   :  { %1343 = vrot.lane.b32.xlu2 %v1296_v59, %s1491_s26 }
 0x593   :  { %v1300_v62 = vpop.permute.xlu2 %1299 }
 0x594   :  { %v1302_v48 = vmul.f32 %v1300_v62, %v2310_v26  ;;  %v1303_v18 = vmul.f32 %v1300_v62, %v2312_v35  ;;  %v1304_v3 = vmul.f32 %v1300_v62, %v2318_v37  ;;  %v1305_v23 = vmul.f32 %v1300_v62, %v2322_v41 }
 0x595   :  { %v1306_v9 = vmul.f32 %v1300_v62, %v2327_v63  ;;  %v1307_v10 = vmul.f32 %v1300_v62, %v2332_v22  ;;  %v1350_v26 = vsel %vm392_vm4, %v1338_v44, %v1340_v51  ;;  %v1351_v35 = vsel %vm392_vm4, %v1340_v51, %v1342_v2 }
 0x596   :  { %v1308_v4 = vmul.f32 %v1300_v62, %v2338_v20 }
 0x59b   :  { %v1312_v13 = vpop.permute.xlu2 %1311 }
 0x59c   :  { %v1314_v34 = vadd.f32 %v1312_v13, %v1302_v48  ;;  %v1315_v19 = vadd.f32 %v1312_v13, %v1303_v18  ;;  %v1316_v21 = vadd.f32 %v1312_v13, %v1304_v3  ;;  %v1317_v45 = vadd.f32 %v1312_v13, %v1305_v23 }
 0x59d   :  { %v1318_v37 = vadd.f32 %v1312_v13, %v1306_v9  ;;  %v1319_v11 = vadd.f32 %v1312_v13, %v1307_v10  ;;  %v1320_v31 = vadd.f32 %v1312_v13, %v1308_v4 }
 0x59e   :  { %v1360_v41 = vadd.f32 %v1346_v5, %v1314_v34  ;;  %v1361_v24 = vadd.f32 %v1347_v15, %v1315_v19  ;;  %v1362_v25 = vadd.f32 %v1348_v17, %v1316_v21  ;;  %v1363_v6 = vadd.f32 %v1349_v7, %v1317_v45 }
 0x59f   :  { %v1364_v47 = vadd.f32 %v1350_v26, %v1318_v37  ;;  %v1365_v54 = vadd.f32 %v1351_v35, %v1319_v11 }
 0x5a0   :  { %v1367_v63 = vmax.f32 %v1360_v41, 0.0  ;;  %v1368_v27 = vmax.f32 %v1361_v24, 0.0  ;;  %v1369_v22 = vmax.f32 %v1362_v25, 0.0  ;;  %v1370_v46 = vmax.f32 %v1363_v6, 0.0 }
 0x5a1   :  { %v1371_v30 = vmax.f32 %v1364_v47, 0.0  ;;  %v1372_v1 = vmax.f32 %v1365_v54, 0.0 }
 0x5a2   :  { %1374 = vst [vmem:[#allocation5] sm:$0xff] %v1367_v63 }
 0x5a3   :  { %1375 = vst [vmem:[#allocation5 + $0x8] sm:$0xff] %v1368_v27  ;;  %v1344_v8 = vpop.permute.xlu2 %1343 }
 0x5a4   :  { %1376 = vst [vmem:[#allocation5 + $0x10] sm:$0xff] %v1369_v22  ;;  %v1352_v57 = vsel %vm392_vm4, %v1342_v2, %v1344_v8 }
 0x5a5   :  { %1377 = vst [vmem:[#allocation5 + $0x18] sm:$0xff] %v1370_v46  ;;  %v1366_v36 = vadd.f32 %v1352_v57, %v1320_v31 }
 0x5a6   :  { %1378 = vst [vmem:[#allocation5 + $0x20] sm:$0xff] %v1371_v30 }
 0x5a7   :  { %1379 = vst [vmem:[#allocation5 + $0x28] sm:$0xff] %v1372_v1  ;;  %v1373_v20 = vmax.f32 %v1366_v36, 0.0 }
 0x5a9   :  { %1380 = vst [vmem:[#allocation5 + $0x30] sm:$0xff] %v1373_v20 }
 0x5aa   :  { %1391 = dma.vmem_to_hbm [thread:$0]  %s1387_s10, 896, %s1389_s25, [#allocation4]  }
 0x5ab   :  { %1483 = dma.done.wait [#allocation4], 896  }
 0x5ac   :  { %1484 = vsyncadd [#allocation4], 4294966400 }
 0x5ad   :  { %1396 = vsyncpa [#allocation3], 1 }
 0x5ae   :  { %1397 = vsyncpa [#allocation4], 1 }

</bundles_post_ra>
